<compile_context>
chip_gen: v5e
topology: v5e:2x2
jax: 0.10.0
libtpu: 0.0.40
codegen_flags: <defaults>
</compile_context>

<pallas_src>
import functools

import jax
import jax.numpy as jnp
from jax import lax
from jax.experimental import pallas as pl
from jax.experimental.pallas import tpu as pltpu


# --------------------------------------------------------------------------
# Feature kernel:  conv1->bn1->relu -> conv2->bn2->relu -> conv3->bn3 -> max
# over points.  Grid: (C, B, n_tiles_per_split); gmax_ref is a persistent VMEM
# scratch holding the running max over point tiles for the current (c, b) row.
# NOTE: correctness relies on n being the innermost "arbitrary" axis (the
# output block is resident across n and written on the last n step).
# --------------------------------------------------------------------------
def _feature_kernel(x_ref, w1t_ref, b1_ref, w2_ref, b2_ref, w3_ref, b3_ref,
                    o_ref, gmax_ref, *, tile_n, n_per_split, n_valid,
                    needs_mask):
    c = pl.program_id(0)
    n = pl.program_id(2)

    x = x_ref[0]                        # (c_in, tile_n) f32, lane-dense DMA
    c_in = x.shape[0]
    w1t = w1t_ref[...]                  # (64, c_in)

    # conv1: K = c_in is tiny -> VPU outer-product FMAs in channel-major form
    # (keeps the MXU free for the big dots; no wasted K=3 systolic pass).
    h_t = w1t[:, 0:1] * x[0:1, :]       # (64, tile_n)
    for k in range(1, c_in):
        h_t = h_t + w1t[:, k:k + 1] * x[k:k + 1, :]

    # Back to points-major with one aligned (64, tile_n) XLU transpose.
    h = h_t.T + b1_ref[...]             # (tile_n, 64)
    h = jnp.maximum(h, 0.0)             # relu(bn1(conv1(x)))

    # conv2 + bn2 + relu  (bf16 MXU inputs, f32 accumulation)
    h = jnp.dot(h.astype(jnp.bfloat16), w2_ref[...],
                preferred_element_type=jnp.float32) + b2_ref[...]
    h = jnp.maximum(h, 0.0)

    # conv3 + bn3  (no relu before the max, matching the reference module)
    h = jnp.dot(h.astype(jnp.bfloat16), w3_ref[...],
                preferred_element_type=jnp.float32) + b3_ref[...]

    if needs_mask:
        # Padded final-tile points must not contribute to the max.
        base = (c * n_per_split + n) * tile_n
        pid = base + lax.broadcasted_iota(jnp.int32, (tile_n, 1), 0)
        h = jnp.where(pid < n_valid, h, -jnp.inf)

    tile_max = jnp.max(h, axis=0, keepdims=True)        # (1, nlatent)

    @pl.when(n == 0)
    def _():
        gmax_ref[...] = jnp.full(gmax_ref.shape, -jnp.inf, jnp.float32)

    gmax_ref[...] = jnp.maximum(gmax_ref[...], tile_max)

    @pl.when(n == pl.num_programs(2) - 1)
    def _():
        o_ref[0] = gmax_ref[...]        # lane-dense (1, nlatent) writeback


# --------------------------------------------------------------------------
# Head kernel: relu(bn4(lin1(g))) -> relu(bn5(lin2(.))) for the whole batch in
# one (B, nlatent) @ (nlatent, nlatent) pass (f32; it is tiny, keeps accuracy).
# --------------------------------------------------------------------------
def _head_kernel(g_ref, wl1_ref, bl1_ref, wl2_ref, bl2_ref, o_ref):
    y = jnp.dot(g_ref[...], wl1_ref[...],
                preferred_element_type=jnp.float32) + bl1_ref[...]
    y = jnp.maximum(y, 0.0)
    y = jnp.dot(y, wl2_ref[...],
                preferred_element_type=jnp.float32) + bl2_ref[...]
    o_ref[...] = jnp.maximum(y, 0.0)


def pointnet_forward(x_bcn, params, *, tile_n=1024, core_split=None):
    """x_bcn: (B, dim_input, N) float32  ->  (B, nlatent) float32."""
    B, c_in, N = x_bcn.shape
    nlatent = params["w3"].shape[1]

    # Point tiling (lane axis).  Ragged N -> pad last tile, mask with -inf.
    tile_n = min(tile_n, N)
    n_tiles = -(-N // tile_n)
    n_pad = n_tiles * tile_n
    needs_mask = n_pad != N
    if needs_mask:
        x_bcn = jnp.pad(x_bcn, ((0, 0), (0, 0), (0, n_pad - N)))

    # Leading split of the point-tile axis so both TensorCores (v7x) get work
    # when B alone cannot keep them busy; harmless extra loop axis on 1-TC chips.
    if core_split is None:
        core_split = 2 if (n_tiles % 2 == 0 and B % 2 == 1) else 1
    C = core_split
    assert n_tiles % C == 0, (n_tiles, C)
    n_per_split = n_tiles // C

    # One-time weight prep (negligible): channel-major conv1 weight, big conv
    # matmul weights in bf16 (MXU-native; f32 accumulation in-kernel).  Head
    # weights stay f32.
    w1t = jnp.transpose(params["w1"])                   # (64, c_in)
    w2 = params["w2"].astype(jnp.bfloat16)
    w3 = params["w3"].astype(jnp.bfloat16)
    b1, b2, b3 = params["b1"], params["b2"], params["b3"]
    wl1, bl1 = params["wl1"], params["bl1"]
    wl2, bl2 = params["wl2"], params["bl2"]

    def _const(arr):                                    # VMEM-resident constants
        return pl.BlockSpec(arr.shape, lambda c, b, n: (0, 0))

    flops = 2 * B * N * (c_in * 64 + 64 * 128 + 128 * nlatent)
    bytes_accessed = int(
        x_bcn.size * 4 + C * B * nlatent * 4
        + w1t.size * 4 + w2.size * 2 + w3.size * 2
        + (b1.size + b2.size + b3.size) * 4)

    feat_kernel = functools.partial(
        _feature_kernel, tile_n=tile_n, n_per_split=n_per_split,
        n_valid=N, needs_mask=needs_mask)

    gpart = pl.pallas_call(
        feat_kernel,
        out_shape=jax.ShapeDtypeStruct((C * B, 1, nlatent), jnp.float32),
        grid_spec=pltpu.PrefetchScalarGridSpec(
            num_scalar_prefetch=0,
            grid=(C, B, n_per_split),
            in_specs=[
                pl.BlockSpec((1, c_in, tile_n),
                             lambda c, b, n: (b, 0, c * n_per_split + n)),
                _const(w1t), _const(b1),
                _const(w2), _const(b2),
                _const(w3), _const(b3),
            ],
            out_specs=pl.BlockSpec((1, 1, nlatent),
                                   lambda c, b, n: (c * B + b, 0, 0)),
            scratch_shapes=[pltpu.VMEM((1, nlatent), jnp.float32)],
        ),
        compiler_params=pltpu.CompilerParams(
            dimension_semantics=("parallel", "parallel", "arbitrary")),
        cost_estimate=pl.CostEstimate(
            flops=flops, transcendentals=0, bytes_accessed=bytes_accessed),
    )(x_bcn, w1t, b1, w2, b2, w3, b3)

    # Combine the per-core partial maxes (trivial when C == 1).
    g = gpart.reshape(C, B, nlatent)
    g = jnp.max(g, axis=0) if C > 1 else g[0]           # (B, nlatent)

    # Batched head: one M=B MXU pass instead of B serial M=1 passes.
    out = pl.pallas_call(
        _head_kernel,
        out_shape=jax.ShapeDtypeStruct((B, nlatent), jnp.float32),
        grid_spec=pltpu.PrefetchScalarGridSpec(
            num_scalar_prefetch=0,
            grid=(1,),
            in_specs=[
                pl.BlockSpec((B, nlatent), lambda i: (0, 0)),
                pl.BlockSpec(wl1.shape, lambda i: (0, 0)),
                pl.BlockSpec(bl1.shape, lambda i: (0, 0)),
                pl.BlockSpec(wl2.shape, lambda i: (0, 0)),
                pl.BlockSpec(bl2.shape, lambda i: (0, 0)),
            ],
            out_specs=pl.BlockSpec((B, nlatent), lambda i: (0, 0)),
        ),
    )(g, wl1, bl1, wl2, bl2)

    return out                              # torch: x.view(-1, nlatent) / squeeze(2)


# --------------------------------------------------------------------------
# Deterministic parameter construction (conv/linear weights + BN folded in).
# --------------------------------------------------------------------------
def init_params(key, dim_input=3, nlatent=256, eps=1e-5):
    keys = jax.random.split(key, 30)
    ki = iter(range(30))

    def layer(c_in, c_out):
        w = jax.random.normal(keys[next(ki)], (c_in, c_out), jnp.float32)
        w = w * (1.0 / jnp.sqrt(jnp.float32(c_in)))
        b = 0.1 * jax.random.normal(keys[next(ki)], (1, c_out), jnp.float32)
        return w, b

    def bn_affine(c):
        gamma = 1.0 + 0.1 * jax.random.normal(keys[next(ki)], (1, c), jnp.float32)
        beta = 0.1 * jax.random.normal(keys[next(ki)], (1, c), jnp.float32)
        mean = 0.1 * jax.random.normal(keys[next(ki)], (1, c), jnp.float32)
        var = jnp.abs(jax.random.normal(keys[next(ki)], (1, c), jnp.float32)) + 0.5
        scale = gamma / jnp.sqrt(var + eps)
        shift = beta - mean * scale
        return scale, shift

    def fold(w, b, scale, shift):
        return w * scale, b * scale + shift

    params = {}
    w, b = layer(dim_input, 64)
    s, t = bn_affine(64)
    params["w1"], params["b1"] = fold(w, b, s, t)          # conv1 + bn1
    w, b = layer(64, 128)
    s, t = bn_affine(128)
    params["w2"], params["b2"] = fold(w, b, s, t)          # conv2 + bn2
    w, b = layer(128, nlatent)
    s, t = bn_affine(nlatent)
    params["w3"], params["b3"] = fold(w, b, s, t)          # conv3 + bn3
    w, b = layer(nlatent, nlatent)
    s, t = bn_affine(nlatent)
    params["wl1"], params["bl1"] = fold(w, b, s, t)        # lin1 + bn4
    w, b = layer(nlatent, nlatent)
    s, t = bn_affine(nlatent)
    params["wl2"], params["bl2"] = fold(w, b, s, t)        # lin2 + bn5
    return params


def _reference(x_bcn, p):
    x = jnp.transpose(x_bcn, (0, 2, 1))
    h = jnp.maximum(x @ p["w1"] + p["b1"], 0.0)
    h = jnp.maximum(h @ p["w2"] + p["b2"], 0.0)
    h = h @ p["w3"] + p["b3"]
    g = jnp.max(h, axis=1)
    y = jnp.maximum(g @ p["wl1"] + p["bl1"], 0.0)
    y = jnp.maximum(y @ p["wl2"] + p["bl2"], 0.0)
    return y


if __name__ == "__main__":
    B, DIM_INPUT, N_POINTS, NLATENT = 2, 3, 256, 256
    key = jax.random.PRNGKey(0)
    kx, kp = jax.random.split(key)

    x = jax.random.normal(kx, (B, DIM_INPUT, N_POINTS), jnp.float32)
    params = init_params(kp, dim_input=DIM_INPUT, nlatent=NLATENT)

    out = pointnet_forward(x, params)
    out = jax.block_until_ready(out)

    ref = _reference(x, params)            # pure f32 reference
    assert out.shape == (B, NLATENT), out.shape
    # Tolerance relaxed vs the pure-f32 reference because conv2/conv3 run in
    # bf16 (f32 accumulation) inside the kernel; the head is f32.
    assert bool(jnp.allclose(out, ref, atol=3e-2, rtol=3e-2)), \
        "mismatch vs reference"
    print("KERNEL_OK")
</pallas_src>

<mosaic_0001>
module attributes {stable_mosaic.version = 11 : i64} {
  func.func @_feature_kernel(%arg0: i32, %arg1: i32, %arg2: i32, %arg3: memref<1x3x256xf32, #tpu.memory_space<vmem>>, %arg4: memref<64x3xf32, #tpu.memory_space<vmem>>, %arg5: memref<1x64xf32, #tpu.memory_space<vmem>>, %arg6: memref<64x128xbf16, #tpu.memory_space<vmem>>, %arg7: memref<1x128xf32, #tpu.memory_space<vmem>>, %arg8: memref<128x256xbf16, #tpu.memory_space<vmem>>, %arg9: memref<1x256xf32, #tpu.memory_space<vmem>>, %arg10: memref<1x1x256xf32, #tpu.memory_space<vmem>>, %arg11: memref<1x256xf32, #tpu.memory_space<vmem>>) attributes {dimension_semantics = [#tpu.dimension_semantics<parallel>, #tpu.dimension_semantics<parallel>, #tpu.dimension_semantics<arbitrary>], iteration_bounds = array<i64: 1, 2, 1>, scalar_prefetch = 0 : i64, scratch_operands = 1 : i64, tpu.core_type = #tpu.core_type<tc>, window_params = [{transform_indices = @transform_0, window_bounds = array<i64: 1, 3, 256>}, {pipeline_mode = #tpu.pipeline_mode<synchronous>, transform_indices = @transform_1, window_bounds = array<i64: 64, 3>}, {pipeline_mode = #tpu.pipeline_mode<synchronous>, transform_indices = @transform_2, window_bounds = array<i64: 1, 64>}, {pipeline_mode = #tpu.pipeline_mode<synchronous>, transform_indices = @transform_3, window_bounds = array<i64: 64, 128>}, {pipeline_mode = #tpu.pipeline_mode<synchronous>, transform_indices = @transform_4, window_bounds = array<i64: 1, 128>}, {pipeline_mode = #tpu.pipeline_mode<synchronous>, transform_indices = @transform_5, window_bounds = array<i64: 128, 256>}, {pipeline_mode = #tpu.pipeline_mode<synchronous>, transform_indices = @transform_6, window_bounds = array<i64: 1, 256>}, {transform_indices = @transform_7, window_bounds = array<i64: 1, 1, 256>}]} {
    %c0 = arith.constant 0 : index
    %c0_0 = arith.constant 0 : index
    %c0_1 = arith.constant 0 : index
    %0 = vector.load %arg3[%c0, %c0_0, %c0_1] : memref<1x3x256xf32, #tpu.memory_space<vmem>>, vector<1x3x256xf32>
    %1 = vector.shape_cast %0 : vector<1x3x256xf32> to vector<3x256xf32>
    %c0_2 = arith.constant 0 : index
    %c0_3 = arith.constant 0 : index
    %2 = vector.load %arg4[%c0_2, %c0_3] : memref<64x3xf32, #tpu.memory_space<vmem>>, vector<64x3xf32>
    %3 = vector.extract_strided_slice %2 {offsets = [0, 0], sizes = [64, 1], strides = [1, 1]} : vector<64x3xf32> to vector<64x1xf32>
    %4 = vector.extract_strided_slice %1 {offsets = [0, 0], sizes = [1, 256], strides = [1, 1]} : vector<3x256xf32> to vector<1x256xf32>
    %5 = vector.broadcast %3 : vector<64x1xf32> to vector<64x256xf32>
    %6 = vector.broadcast %4 : vector<1x256xf32> to vector<64x256xf32>
    %7 = arith.mulf %5, %6 : vector<64x256xf32>
    %8 = vector.extract_strided_slice %2 {offsets = [0, 1], sizes = [64, 1], strides = [1, 1]} : vector<64x3xf32> to vector<64x1xf32>
    %9 = vector.extract_strided_slice %1 {offsets = [1, 0], sizes = [1, 256], strides = [1, 1]} : vector<3x256xf32> to vector<1x256xf32>
    %10 = vector.broadcast %8 : vector<64x1xf32> to vector<64x256xf32>
    %11 = vector.broadcast %9 : vector<1x256xf32> to vector<64x256xf32>
    %12 = arith.mulf %10, %11 : vector<64x256xf32>
    %13 = arith.addf %7, %12 : vector<64x256xf32>
    %14 = vector.extract_strided_slice %2 {offsets = [0, 2], sizes = [64, 1], strides = [1, 1]} : vector<64x3xf32> to vector<64x1xf32>
    %15 = vector.extract_strided_slice %1 {offsets = [2, 0], sizes = [1, 256], strides = [1, 1]} : vector<3x256xf32> to vector<1x256xf32>
    %16 = vector.broadcast %14 : vector<64x1xf32> to vector<64x256xf32>
    %17 = vector.broadcast %15 : vector<1x256xf32> to vector<64x256xf32>
    %18 = arith.mulf %16, %17 : vector<64x256xf32>
    %19 = arith.addf %13, %18 : vector<64x256xf32>
    %20 = tpu.transpose %19, [1, 0] : vector<64x256xf32> -> vector<256x64xf32>
    %c0_4 = arith.constant 0 : index
    %c0_5 = arith.constant 0 : index
    %21 = vector.load %arg5[%c0_4, %c0_5] : memref<1x64xf32, #tpu.memory_space<vmem>>, vector<1x64xf32>
    %22 = vector.broadcast %21 : vector<1x64xf32> to vector<256x64xf32>
    %23 = arith.addf %20, %22 : vector<256x64xf32>
    %cst = arith.constant 0.000000e+00 : f32
    %24 = vector.broadcast %cst : f32 to vector<256x64xf32>
    %25 = arith.maximumf %23, %24 : vector<256x64xf32>
    %26 = arith.truncf %25 : vector<256x64xf32> to vector<256x64xbf16>
    %c0_6 = arith.constant 0 : index
    %c0_7 = arith.constant 0 : index
    %27 = vector.load %arg6[%c0_6, %c0_7] : memref<64x128xbf16, #tpu.memory_space<vmem>>, vector<64x128xbf16>
    %cst_8 = arith.constant dense<0.000000e+00> : vector<256x128xf32>
    %28 = tpu.matmul %26, %27, %cst_8 {dimension_numbers = #tpu.dot_dimension_numbers<[1], [0], [0], [1], [0, 0, 1, 1], [], []>} : vector<256x64xbf16>, vector<64x128xbf16>, vector<256x128xf32> -> vector<256x128xf32>
    %c0_9 = arith.constant 0 : index
    %c0_10 = arith.constant 0 : index
    %29 = vector.load %arg7[%c0_9, %c0_10] : memref<1x128xf32, #tpu.memory_space<vmem>>, vector<1x128xf32>
    %30 = vector.broadcast %29 : vector<1x128xf32> to vector<256x128xf32>
    %31 = arith.addf %28, %30 : vector<256x128xf32>
    %cst_11 = arith.constant 0.000000e+00 : f32
    %32 = vector.broadcast %cst_11 : f32 to vector<256x128xf32>
    %33 = arith.maximumf %31, %32 : vector<256x128xf32>
    %34 = arith.truncf %33 : vector<256x128xf32> to vector<256x128xbf16>
    %c0_12 = arith.constant 0 : index
    %c0_13 = arith.constant 0 : index
    %35 = vector.load %arg8[%c0_12, %c0_13] : memref<128x256xbf16, #tpu.memory_space<vmem>>, vector<128x256xbf16>
    %cst_14 = arith.constant dense<0.000000e+00> : vector<256x256xf32>
    %36 = tpu.matmul %34, %35, %cst_14 {dimension_numbers = #tpu.dot_dimension_numbers<[1], [0], [0], [1], [0, 0, 1, 1], [], []>} : vector<256x128xbf16>, vector<128x256xbf16>, vector<256x256xf32> -> vector<256x256xf32>
    %c0_15 = arith.constant 0 : index
    %c0_16 = arith.constant 0 : index
    %37 = vector.load %arg9[%c0_15, %c0_16] : memref<1x256xf32, #tpu.memory_space<vmem>>, vector<1x256xf32>
    %38 = vector.broadcast %37 : vector<1x256xf32> to vector<256x256xf32>
    %39 = arith.addf %36, %38 : vector<256x256xf32>
    %cst_17 = arith.constant dense<0xFF800000> : vector<256xf32>
    %40 = vector.multi_reduction <maximumf>, %39, %cst_17 [0] : vector<256x256xf32> to vector<256xf32>
    %41 = vector.shape_cast %40 : vector<256xf32> to vector<1x256xf32>
    %c0_i32 = arith.constant 0 : i32
    %42 = arith.cmpi eq, %arg2, %c0_i32 : i32
    %43 = arith.extui %42 : i1 to i32
    %c0_i32_18 = arith.constant 0 : i32
    %44 = arith.cmpi ne, %43, %c0_i32_18 : i32
    scf.if %44 {
      %cst_25 = arith.constant 0xFF800000 : f32
      %51 = vector.broadcast %cst_25 : f32 to vector<1x256xf32>
      %c0_26 = arith.constant 0 : index
      %c0_27 = arith.constant 0 : index
      %52 = vector.load %arg11[%c0_26, %c0_27] : memref<1x256xf32, #tpu.memory_space<vmem>>, vector<1x256xf32>
      tpu.vector_store %arg11[%c0_26, %c0_27], %51 {strides = array<i32>} : memref<1x256xf32, #tpu.memory_space<vmem>>, vector<1x256xf32>,
    } else {
    }
    %c0_19 = arith.constant 0 : index
    %c0_20 = arith.constant 0 : index
    %45 = vector.load %arg11[%c0_19, %c0_20] : memref<1x256xf32, #tpu.memory_space<vmem>>, vector<1x256xf32>
    %46 = arith.maximumf %45, %41 : vector<1x256xf32>
    %c0_21 = arith.constant 0 : index
    %c0_22 = arith.constant 0 : index
    %47 = vector.load %arg11[%c0_21, %c0_22] : memref<1x256xf32, #tpu.memory_space<vmem>>, vector<1x256xf32>
    tpu.vector_store %arg11[%c0_21, %c0_22], %46 {strides = array<i32>} : memref<1x256xf32, #tpu.memory_space<vmem>>, vector<1x256xf32>,
    %c0_i32_23 = arith.constant 0 : i32
    %48 = arith.cmpi eq, %arg2, %c0_i32_23 : i32
    %49 = arith.extui %48 : i1 to i32
    %c0_i32_24 = arith.constant 0 : i32
    %50 = arith.cmpi ne, %49, %c0_i32_24 : i32
    scf.if %50 {
      %c0_25 = arith.constant 0 : index
      %c0_26 = arith.constant 0 : index
      %51 = vector.load %arg11[%c0_25, %c0_26] : memref<1x256xf32, #tpu.memory_space<vmem>>, vector<1x256xf32>
      %c0_27 = arith.constant 0 : index
      %c0_28 = arith.constant 0 : index
      %c0_29 = arith.constant 0 : index
      %52 = vector.load %arg10[%c0_27, %c0_28, %c0_29] : memref<1x1x256xf32, #tpu.memory_space<vmem>>, vector<1x1x256xf32>
      %53 = vector.shape_cast %52 : vector<1x1x256xf32> to vector<1x256xf32>
      %54 = vector.shape_cast %51 : vector<1x256xf32> to vector<1x1x256xf32>
      tpu.vector_store %arg10[%c0_27, %c0_28, %c0_29], %54 {strides = array<i32>} : memref<1x1x256xf32, #tpu.memory_space<vmem>>, vector<1x1x256xf32>,
    } else {
    }
    return
  }
  func.func @transform_0(%arg0: i32, %arg1: i32, %arg2: i32) -> (i32, i32, i32) {
    %c1_i32 = arith.constant 1 : i32
    %0 = arith.muli %arg0, %c1_i32 : i32
    %1 = arith.addi %0, %arg2 : i32
    %c0_i32 = arith.constant 0 : i32
    %c0_i32_0 = arith.constant 0 : i32
    return %arg1, %c0_i32, %1 : i32, i32, i32
  }
  func.func @transform_1(%arg0: i32, %arg1: i32, %arg2: i32) -> (i32, i32) {
    %c0_i32 = arith.constant 0 : i32
    %c0_i32_0 = arith.constant 0 : i32
    %c0_i32_1 = arith.constant 0 : i32
    return %c0_i32, %c0_i32_0 : i32, i32
  }
  func.func @transform_2(%arg0: i32, %arg1: i32, %arg2: i32) -> (i32, i32) {
    %c0_i32 = arith.constant 0 : i32
    %c0_i32_0 = arith.constant 0 : i32
    %c0_i32_1 = arith.constant 0 : i32
    return %c0_i32, %c0_i32_0 : i32, i32
  }
  func.func @transform_3(%arg0: i32, %arg1: i32, %arg2: i32) -> (i32, i32) {
    %c0_i32 = arith.constant 0 : i32
    %c0_i32_0 = arith.constant 0 : i32
    %c0_i32_1 = arith.constant 0 : i32
    return %c0_i32, %c0_i32_0 : i32, i32
  }
  func.func @transform_4(%arg0: i32, %arg1: i32, %arg2: i32) -> (i32, i32) {
    %c0_i32 = arith.constant 0 : i32
    %c0_i32_0 = arith.constant 0 : i32
    %c0_i32_1 = arith.constant 0 : i32
    return %c0_i32, %c0_i32_0 : i32, i32
  }
  func.func @transform_5(%arg0: i32, %arg1: i32, %arg2: i32) -> (i32, i32) {
    %c0_i32 = arith.constant 0 : i32
    %c0_i32_0 = arith.constant 0 : i32
    %c0_i32_1 = arith.constant 0 : i32
    return %c0_i32, %c0_i32_0 : i32, i32
  }
  func.func @transform_6(%arg0: i32, %arg1: i32, %arg2: i32) -> (i32, i32) {
    %c0_i32 = arith.constant 0 : i32
    %c0_i32_0 = arith.constant 0 : i32
    %c0_i32_1 = arith.constant 0 : i32
    return %c0_i32, %c0_i32_0 : i32, i32
  }
  func.func @transform_7(%arg0: i32, %arg1: i32, %arg2: i32) -> (i32, i32, i32) {
    %c2_i32 = arith.constant 2 : i32
    %0 = arith.muli %arg0, %c2_i32 : i32
    %1 = arith.addi %0, %arg1 : i32
    %c0_i32 = arith.constant 0 : i32
    %c0_i32_0 = arith.constant 0 : i32
    %c0_i32_1 = arith.constant 0 : i32
    return %1, %c0_i32, %c0_i32_0 : i32, i32, i32
  }
}

</mosaic_0001>

<bundles_post_ra>
// kernel: tpu_custom_call.1
= control target key start
LH: loop header
LB: loop body
LE: loop exit
PB: predicated region body
PF: predicated region fallthrough
CT: control target
= control target key end

     0   :  { %12 = vsyncpa [#allocation4], 0  ;;  %s2259_s0 = inlined_call_operand.vmem [shape: f32[2,3,256], index: 0, kind: input, shape index: {}]   ;;  %s2260_s1 = inlined_call_operand.vmem [shape: f32[64,3], index: 1, kind: input, shape index: {}]   ;;  %s2261_s2 = inlined_call_operand.vmem [shape: f32[1,64], index: 2, kind: input, shape index: {}]   ;;  %s2262_s3 = inlined_call_operand.vmem [shape: bf16[64,128], index: 3, kind: input, shape index: {}]   ;;  %s2263_s4 = inlined_call_operand.vmem [shape: f32[1,128], index: 4, kind: input, shape index: {}]   ;;  %s2264_s5 = inlined_call_operand.hbm [shape: bf16[128,256], index: 5, kind: input, shape index: {}]   ;;  %s2265_s6 = inlined_call_operand.vmem [shape: f32[1,256], index: 6, kind: input, shape index: {}]   ;;  %s2266_s7 = inlined_call_operand.hbm [shape: f32[2,1,256], index: 7, kind: output, shape index: {}]  }
   0x1   :  { %13 = vsyncpa [#allocation5], 0 }
   0x2   :  { %15 = vsyncpa [#allocation5 + $0x1], 0  ;;  %s1816_s24 = smov 0   ;;  %s1818_s25 = smov 0  }
   0x3   :  { %s1820_s26 = smov 0   ;;  %s1822_s27 = smov 0  }
   0x4   :  { %s1824_s28 = smov 0   ;;  %s1826_s29 = smov 0  }
   0x5 LB: > { %s1414_s30 = sadd.s32 4294967295, %s1767_s29   ;;  %s1415_s8 = sadd.s32 4294967294, %s1767_s29   ;;  %s1767_s29 = sphi %s1826_s29, %s21_s29   ;;  %s1763_s28 = sphi %s1824_s28, %s2275_s28   ;;  %s1759_s27 = sphi %s1822_s27, %s2274_s27   ;;  %s1755_s26 = sphi %s1820_s26, %s2273_s26   ;;  %s1751_s25 = sphi %s1818_s25, %s2272_s25   ;;  %s1747_s24 = sphi %s1816_s24, %s2271_s24  }
   0x6   : > { %s36_s9 = sadd.s32 1, %s1763_s28  ;;  %s207_s10 = sadd.s32 1, %s1755_s26 }
   0x7   : > { %p38_p0 = scmp.ge.s32.totalorder %s36_s9, 2  ;;  %p217_p1 = scmp.ne.s32.totalorder %s1755_s26, %s1751_s25 }
   0x8   : > { %p218_p2 = scmp.eq.s32.totalorder %s1414_s30, 1  ;;  %p223_p3 = scmp.ne.s32.totalorder %s1751_s25, %s1747_s24 }
   0x9   : > { %s2277_s9 = smov (%p38_p0, %s36_s9), 0  ;;  %p224_p5 = scmp.eq.s32.totalorder %s1415_s8, 1 }
   0xa   : > { %p1856_p4 = por %p218_p2, %p217_p1  ;;  %s204_s12 = ssub.s32 %s1763_s28, %s2277_s9 }
   0xb   : > { %p1416_p6 = scmp.ge.s32.totalorder %s1767_s29, 1  ;;  %p205_p7 = scmp.eq.s32.totalorder %s204_s12, 0 }
   0xc   : > { %p1863_p8 = por %p224_p5, %p223_p3  ;;  %p231_p9 = scmp.lt.s32.totalorder %s1767_s29, 3 }
   0xd   : > { %s1869_s14 = scalar_select %p205_p7, %s1755_s26, %s207_s10  }
   0xe   : > { %p232_p10 = pnand %p1416_p6, %p231_p9  ;;  %p1579_p11 = scmp.eq.s32.totalorder %s1414_s30, 0 }
   0xf   : > { %s254_s17 = sshll.u32 %s2264_s5, 4  ;;  %s1769_s18 = smov [#allocation3]   ;;  %s255_s17 = int_to_ptr.hbm [resolvable:$true] %s254_s17 }
  0x10   : > { %p1571_p12 = pneg %p232_p10  ;;  %s256_s19 = sshll.u32 %s1769_s18, 4  ;;  %s257_s19 = int_to_ptr.vmem [resolvable:$true] %s256_s19 }
  0x11   : > { %s1770_s20 = smov 128   ;;  %s1771_s21 = smov 8  }
  0x12   : > { %p1572_p13 = pnand %p1579_p11, %p1571_p12  ;;  %290 = sbr.rel (%p232_p10) target bundleno = 970 (0x3ca), region = 48 }
  0x14   : > { %1574 = dma.hbm_to_vmem [thread:$0]  (!%p1572_p13), %s255_s17, 2048, %s257_s19, [#allocation4], %s1770_s20, %s1770_s20, %s1771_s21  }
  0x17   : > { %1738 = dma.done.wait (%p1579_p11), [#allocation4], 2048  }
  0x18   : > { %1740 = vsyncadd (%p1579_p11), [#allocation4], 4294965248  ;;  %v1772_v0 = vmov 2   ;;  %v1773_v1 = vmov 1   ;;  %v346_v2 = vld [vmem:[%s2260_s1 + $0x10] sm:$0xff]  ;;  %v344_v3 = vld [vmem:[%s2260_s1] sm:$0xff] }
  0x19   : > { %1643 = vset.pattern.permute.xlu0 %v1772_v0  ;;  %1638 = vset.pattern.permute.xlu1 %v1772_v0  ;;  %v345_v4 = vld [vmem:[%s2260_s1 + $0x8] sm:$0xff]  ;;  %v1774_v5 = vmov 0   ;;  %v348_v6 = vld [vmem:[%s2260_s1 + $0x20] sm:$0xff]  ;;  %v347_v7 = vld [vmem:[%s2260_s1 + $0x18] sm:$0xff]  ;;  %p330_p0 = scmp.lt.s32.totalorder %s1759_s27, 1  ;;  %vm739_vm0 = vcmask 523264  }
  0x1a   : > { %1640 = vset.pattern.permute.xlu2 %v1773_v1  ;;  %494 = vperm.xlu0 %1643, %v346_v2   ;;  %v350_v8 = vld [vmem:[%s2260_s1 + $0x30] sm:$0xff]  ;;  %v351_v9 = vld [vmem:[%s2260_s1 + $0x38] sm:$0xff]  ;;  %v349_v10 = vld [vmem:[%s2260_s1 + $0x28] sm:$0xff]  ;;  %vm1292_vm2 = vcmask 1040384   ;;  %s325_s18 = sand.u32 1, %s1751_s25   ;;  %s1521_s20 = sshll.u32 %s1759_s27, 1 }
  0x1b   : > { %486 = vperm.xlu1 %1638, %v344_v3   ;;  %420 = vperm.xlu2 %1640, %v345_v4   ;;  %s331_s8 = scalar_select %p330_p0, %s1759_s27, 1 }
  0x1c   : > { %s1421_s19 = sshll.u32 %s325_s18, 1  ;;  %s1319_s23 = scalar_lea.hbm %s2266_s7, %s1521_s20 }
  0x1d   : > { %s1524_s10 = sshll.u32 %s331_s8, 3  ;;  %s327_s30 = scalar_lea.vmem [#allocation6], %s1421_s19 }
  0x1e   : > { %s337_s16 = scalar_lea.vmem %s2259_s0, %s1524_s10  ;;  %s1321_s8 = sshll.u32 %s327_s30, 4  ;;  %s1322_s8 = int_to_ptr.vmem [resolvable:$true] %s1321_s8 }
  0x1f   : > { %v343_v19 = vld [vmem:[%s337_s16] sm:$0x77]  ;;  %s1323_s10 = sshll.u32 %s1319_s23, 4  ;;  %s1307_s12 = scalar_lea.sflag [#allocation5], %s325_s18  ;;  %s1324_s10 = int_to_ptr.hbm [resolvable:$true] %s1323_s10 }
  0x20   : > { %v447_v21 = vperm.slane %v343_v19, 1  ;;  %v448_v22 = vperm.slane %v343_v19, 5  ;;  %v393_v23 = vperm.slane %v343_v19, 0  ;;  %v394_v24 = vperm.slane %v343_v19, 4  ;;  %s1699_s27 = sshra.s32 %s1324_s10, 4  ;;  %s1705_s19 = scalar_lea.hbm %s2266_s7, 4  ;;  %s1700_s27 = int_to_ptr.hbm [resolvable:$true] %s1699_s27 }
  0x21   : > { %v517_v25 = vperm.slane %v343_v19, 2  ;;  %v518_v26 = vperm.slane %v343_v19, 6  ;;  %s1701_s15 = scalar_lea.hbm %s1700_s27, 2  ;;  %p1706_p5 = scmp.lt.s32.totalorder %s1700_s27, %s2266_s7 }
  0x22   : > { %1644 = vset.pattern.permute.xlu0 %v1773_v1  ;;  %v1905_v27 = vperm.slane %v447_v21, 1  ;;  %v1907_v28 = vperm.slane %v448_v22, 1  ;;  %v1909_v29 = vperm.slane %v393_v23, 0  ;;  %v1911_v30 = vperm.slane %v394_v24, 0  ;;  %v1528_v23 = vld [vmem:[%s2262_s3 + $0x18] sm:$0xff]  ;;  %p1702_p1 = scmp.ne.s32.totalorder %s1700_s27, %s1701_s15  ;;  %p1707_p6 = scmp.lt.s32.totalorder %s1705_s19, %s1701_s15 }
  0x23   : > { %1639 = vset.pattern.permute.xlu1 %v1774_v5  ;;  %416 = vperm.xlu0 %1644, %v344_v3   ;;  %v1913_v31 = vperm.slane %v517_v25, 2  ;;  %v1915_v32 = vperm.slane %v518_v26, 2 }
  0x24   : > { %359 = vperm.xlu1 %1639, %v345_v4   ;;  %1641 = vset.pattern.permute.xlu2 %v1772_v0  ;;  %p1703_p2 = pnand %p1702_p1, %p1856_p4  ;;  %p1708_p7 = por %p1707_p6, %p1706_p5 }
  0x25   : > { %490 = vperm.xlu2 %1641, %v345_v4   ;;  %792 = vmatpush.bf16.msra.mxu0 %v1528_v23 }
  0x26   : > { %1545 = vmatpush.bf16.msra.mxu3 %v1528_v23  ;;  %p1704_p3 = pneg %p1703_p2 }
  0x28   : > { %p1709_p9 = pnand %p1708_p7, %p1704_p3 }
  0x2b   : > { %432 = vperm.xlu0 %1644, %v348_v6  }
  0x2c   : > { %364 = vperm.xlu1 %1639, %v346_v2  }
  0x2d   : > { %1642 = vset.pattern.permute.xlu2 %v1773_v1 }
  0x2e   : > { %424 = vperm.xlu2 %1642, %v346_v2  }
  0x33   : > { %1647 = vset.pattern.permute.xlu0 %v1774_v5 }
  0x34   : > { %369 = vperm.xlu1 %1639, %v347_v7   ;;  %354 = vperm.xlu0 %1647, %v344_v3  }
  0x36   : > { %428 = vperm.xlu2 %1642, %v347_v7  }
  0x3c   : > { %1645 = vset.pattern.permute.xlu1 %v1772_v0  ;;  %384 = vperm.xlu0 %1647, %v350_v8  }
  0x3d   : > { %498 = vperm.xlu1 %1645, %v347_v7  }
  0x3e   : > { %1646 = vset.pattern.permute.xlu2 %v1774_v5 }
  0x3f   : > { %374 = vperm.xlu2 %1646, %v348_v6  }
  0x44   : > { %1652 = vset.pattern.permute.xlu0 %v1772_v0 }
  0x45   : > { %502 = vperm.xlu1 %1645, %v348_v6   ;;  %514 = vperm.xlu0 %1652, %v351_v9  }
  0x47   : > { %379 = vperm.xlu2 %1646, %v349_v10  }
  0x4d   : > { %1648 = vset.pattern.permute.xlu1 %v1773_v1 }
  0x4e   : > { %436 = vperm.xlu1 %1648, %v349_v10  }
  0x4f   : > { %1649 = vset.pattern.permute.xlu2 %v1772_v0 }
  0x50   : > { %506 = vperm.xlu2 %1649, %v349_v10  }
  0x56   : > { %440 = vperm.xlu1 %1648, %v350_v8  }
  0x58   : > { %510 = vperm.xlu2 %1649, %v350_v8  }
  0x5e   : > { %1650 = vset.pattern.permute.xlu1 %v1774_v5 }
  0x5f   : > { %389 = vperm.xlu1 %1650, %v351_v9  }
  0x60   : > { %1651 = vset.pattern.permute.xlu2 %v1773_v1 }
  0x61   : > { %444 = vperm.xlu2 %1651, %v351_v9  }
  0x75   : > { %v421_v11 = vpop.permute.xlu2 %420 }
  0x76   : > { %v455_v44 = vmul.f32 %v1905_v27, %v421_v11  ;;  %v456_v45 = vmul.f32 %v1907_v28, %v421_v11 }
  0x7f   : > { %v491_v14 = vpop.permute.xlu2 %490 }
  0x80   : > { %v525_v50 = vmul.f32 %v1913_v31, %v491_v14  ;;  %v526_v51 = vmul.f32 %v1915_v32, %v491_v14 }
  0x88   : > { %v425_v20 = vpop.permute.xlu2 %424 }
  0x89   : > { %v457_v55 = vmul.f32 %v1905_v27, %v425_v20  ;;  %v458_v56 = vmul.f32 %v1907_v28, %v425_v20 }
  0x8c   : > { %v495_v12 = vpop.permute.xlu0 %494 }
  0x8d   : > { %v487_v13 = vpop.permute.xlu1 %486  ;;  %v527_v0 = vmul.f32 %v1913_v31, %v495_v12  ;;  %v528_v1 = vmul.f32 %v1915_v32, %v495_v12 }
  0x8e   : > { %v523_v40 = vmul.f32 %v1913_v31, %v487_v13  ;;  %v524_v41 = vmul.f32 %v1915_v32, %v487_v13 }
  0x90   : > { %v429_v39 = vpop.permute.xlu2 %428 }
  0x91   : > { %v459_v6 = vmul.f32 %v1905_v27, %v429_v39  ;;  %v460_v7 = vmul.f32 %v1907_v28, %v429_v39 }
  0x95   : > { %v417_v15 = vpop.permute.xlu0 %416 }
  0x96   : > { %v360_v16 = vpop.permute.xlu1 %359  ;;  %v453_v35 = vmul.f32 %v1905_v27, %v417_v15  ;;  %v454_v36 = vmul.f32 %v1907_v28, %v417_v15 }
  0x97   : > { %v401_v46 = vmul.f32 %v1909_v29, %v360_v16  ;;  %v402_v47 = vmul.f32 %v1911_v30, %v360_v16 }
  0x99   : > { %v471_v52 = vadd.f32 %v455_v44, %v401_v46  ;;  %v472_v53 = vadd.f32 %v456_v45, %v402_v47  ;;  %v375_v57 = vpop.permute.xlu2 %374 }
  0x9a   : > { %v407_v16 = vmul.f32 %v1909_v29, %v375_v57  ;;  %v408_v20 = vmul.f32 %v1911_v30, %v375_v57 }
  0x9b   : > { %v541_v58 = vadd.f32 %v525_v50, %v471_v52  ;;  %v542_v59 = vadd.f32 %v526_v51, %v472_v53 }
  0x9d   : > { %v1903_v17 = vpop.permute.xlu0 %432 }
  0x9e   : > { %v365_v18 = vpop.permute.xlu1 %364  ;;  %v461_v21 = vmul.f32 %v1905_v27, %v1903_v17  ;;  %v462_v22 = vmul.f32 %v1907_v28, %v1903_v17 }
  0x9f   : > { %v403_v60 = vmul.f32 %v1909_v29, %v365_v18  ;;  %v404_v61 = vmul.f32 %v1911_v30, %v365_v18 }
  0xa0   : > { %v477_v26 = vadd.f32 %v461_v21, %v407_v16 }
  0xa1   : > { %v473_v62 = vadd.f32 %v457_v55, %v403_v60  ;;  %v474_v63 = vadd.f32 %v458_v56, %v404_v61  ;;  %v380_v3 = vpop.permute.xlu2 %379 }
  0xa3   : > { %v543_v4 = vadd.f32 %v527_v0, %v473_v62  ;;  %v544_v5 = vadd.f32 %v528_v1, %v474_v63 }
  0xa6   : > { %v370_v33 = vpop.permute.xlu1 %369  ;;  %v355_v34 = vpop.permute.xlu0 %354 }
  0xa7   : > { %v399_v37 = vmul.f32 %v1909_v29, %v355_v34  ;;  %v400_v38 = vmul.f32 %v1911_v30, %v355_v34  ;;  %v405_v8 = vmul.f32 %v1909_v29, %v370_v33  ;;  %v406_v9 = vmul.f32 %v1911_v30, %v370_v33 }
  0xa8   : > { %v478_v33 = vadd.f32 %v462_v22, %v408_v20 }
  0xa9   : > { %v469_v42 = vadd.f32 %v453_v35, %v399_v37  ;;  %v470_v43 = vadd.f32 %v454_v36, %v400_v38  ;;  %v475_v13 = vadd.f32 %v459_v6, %v405_v8  ;;  %v476_v12 = vadd.f32 %v460_v7, %v406_v9 }
  0xaa   : > { %v507_v19 = vpop.permute.xlu2 %506  ;;  %v409_v37 = vmul.f32 %v1909_v29, %v380_v3  ;;  %v410_v38 = vmul.f32 %v1911_v30, %v380_v3 }
  0xab   : > { %v540_v48 = vadd.f32 %v524_v41, %v470_v43  ;;  %v539_v49 = vadd.f32 %v523_v40, %v469_v42  ;;  %v533_v43 = vmul.f32 %v1913_v31, %v507_v19  ;;  %v534_v44 = vmul.f32 %v1915_v32, %v507_v19 }
  0xad   : > { %587 = vxpose.xlu2.b32.start [1/8] (short) %v540_v48, 128  ;;  %555 = vxpose.xlu1.b32.start [1/8] (short) %v539_v49, 128 }
  0xae   : > { %v385_v45 = vpop.permute.xlu0 %384 }
  0xaf   : > { %v499_v54 = vpop.permute.xlu1 %498  ;;  %v411_v50 = vmul.f32 %v1909_v29, %v385_v45  ;;  %v412_v51 = vmul.f32 %v1911_v30, %v385_v45 }
  0xb0   : > { %v529_v10 = vmul.f32 %v1913_v31, %v499_v54  ;;  %v530_v11 = vmul.f32 %v1915_v32, %v499_v54 }
  0xb2   : > { %v545_v14 = vadd.f32 %v529_v10, %v475_v13  ;;  %v546_v15 = vadd.f32 %v530_v11, %v476_v12  ;;  %v511_v40 = vpop.permute.xlu2 %510 }
  0xb3   : > { %v535_v56 = vmul.f32 %v1913_v31, %v511_v40  ;;  %v536_v57 = vmul.f32 %v1915_v32, %v511_v40 }
  0xb5   : > { %588 = vxpose.xlu2.b32.cont [2/8] (short) %v542_v59, 128  ;;  %556 = vxpose.xlu1.b32.cont [2/8] (short) %v541_v58, 128 }
  0xb7   : > { %v503_v2 = vpop.permute.xlu1 %502  ;;  %v515_v62 = vpop.permute.xlu0 %514 }
  0xb8   : > { %v531_v24 = vmul.f32 %v1913_v31, %v503_v2  ;;  %v532_v25 = vmul.f32 %v1915_v32, %v503_v2  ;;  %v537_v1 = vmul.f32 %v1913_v31, %v515_v62  ;;  %v1982_v31 = vld [vmem:[%s2261_s2] ss:$0 sm:$0xff] }
  0xba   : > { %v547_v34 = vadd.f32 %v531_v24, %v477_v26  ;;  %v548_v35 = vadd.f32 %v532_v25, %v478_v33 }
  0xbb   : > { %v445_v52 = vpop.permute.xlu2 %444 }
  0xbc   : > { %v467_v58 = vmul.f32 %v1905_v27, %v445_v52  ;;  %v468_v59 = vmul.f32 %v1907_v28, %v445_v52  ;;  %v1514_v52 = vld [vmem:[#allocation3 + $0x70] sm:$0xf] }
  0xbd   : > { %589 = vxpose.xlu2.b32.cont [3/8] (short) %v544_v5, 128  ;;  %557 = vxpose.xlu1.b32.cont [3/8] (short) %v543_v4, 128  ;;  %v538_v4 = vmul.f32 %v1915_v32, %v515_v62  ;;  %v1506_v62 = vld [vmem:[#allocation3 + $0x60] sm:$0xf] }
  0xc0   : > { %v437_v18 = vpop.permute.xlu1 %436 }
  0xc1   : > { %v463_v36 = vmul.f32 %v1905_v27, %v437_v18  ;;  %v464_v17 = vmul.f32 %v1907_v28, %v437_v18 }
  0xc3   : > { %v479_v41 = vadd.f32 %v463_v36, %v409_v37  ;;  %v480_v42 = vadd.f32 %v464_v17, %v410_v38 }
  0xc5   : > { %590 = vxpose.xlu2.b32.cont [4/8] (short) %v546_v15, 128  ;;  %558 = vxpose.xlu1.b32.cont [4/8] (short) %v545_v14, 128  ;;  %v549_v46 = vadd.f32 %v533_v43, %v479_v41  ;;  %v550_v47 = vadd.f32 %v534_v44, %v480_v42 }
  0xc8   : > { %v441_v39 = vpop.permute.xlu1 %440 }
  0xc9   : > { %v465_v48 = vmul.f32 %v1905_v27, %v441_v39  ;;  %v466_v49 = vmul.f32 %v1907_v28, %v441_v39  ;;  %v1527_v27 = vld [vmem:[%s2262_s3 + $0x10] sm:$0xff]  ;;  %v1526_v28 = vld [vmem:[%s2262_s3 + $0x8] sm:$0xff] }
  0xca   : > { %793 = vmatpush.bf16.msra.mxu0 %v1527_v27  ;;  %1546 = vmatpush.bf16.msra.mxu3 %v1527_v27 }
  0xcb   : > { %v481_v54 = vadd.f32 %v465_v48, %v411_v50  ;;  %v482_v55 = vadd.f32 %v466_v49, %v412_v51 }
  0xcd   : > { %591 = vxpose.xlu2.b32.cont [5/8] (short) %v548_v35, 128  ;;  %559 = vxpose.xlu1.b32.cont [5/8] (short) %v547_v34, 128  ;;  %v551_v63 = vadd.f32 %v535_v56, %v481_v54  ;;  %v552_v0 = vadd.f32 %v536_v57, %v482_v55  ;;  %v1543_v54 = vld [vmem:[#allocation3 + $0x74] sm:$0xf]  ;;  %v1516_v57 = vld [vmem:[#allocation3 + $0x78] sm:$0xf0] }
  0xce   : > { %794 = vmatpush.bf16.msra.mxu0 %v1526_v28  ;;  %1547 = vmatpush.bf16.msra.mxu3 %v1526_v28  ;;  %v1539_v28 = vld [vmem:[#allocation3 + $0x54] sm:$0xf] }
  0xd1   : > { %v390_v53 = vpop.permute.xlu1 %389 }
  0xd2   : > { %v413_v60 = vmul.f32 %v1909_v29, %v390_v53  ;;  %v414_v61 = vmul.f32 %v1911_v30, %v390_v53  ;;  %v1525_v29 = vld [vmem:[%s2262_s3] sm:$0xff]  ;;  %v1544_v53 = vld [vmem:[#allocation3 + $0x74] sm:$0xf0] }
  0xd3   : > { %795 = vmatpush.bf16.msra.mxu0 %v1525_v29  ;;  %1548 = vmatpush.bf16.msra.mxu3 %v1525_v29  ;;  %v1515_v56 = vor.u32 %v1544_v53, %v1514_v52  ;;  %v1500_v29 = vld [vmem:[#allocation3 + $0x58] sm:$0xf0]  ;;  %v1460_v52 = vld [vmem:[#allocation3 + $0x8] sm:$0xf0] }
  0xd4   : > { %v483_v2 = vadd.f32 %v467_v58, %v413_v60  ;;  %v484_v3 = vadd.f32 %v468_v59, %v414_v61  ;;  %v2007_v60 = vor.u32 %v1543_v54, %v1516_v57 }
  0xd5   : > { %592 = vxpose.xlu2.b32.cont [6/8] (short) %v550_v47, 128  ;;  %560 = vxpose.xlu1.b32.cont [6/8] (short) %v549_v46, 128 }
  0xd6   : > { %v553_v5 = vadd.f32 %v537_v1, %v483_v2  ;;  %v554_v6 = vadd.f32 %v538_v4, %v484_v3  ;;  %1027 = vmatpush.bf16.msra.mxu1 %v1515_v56  ;;  %1116 = vmatpush.bf16.msra.mxu2 %v2007_v60  ;;  %v1508_v2 = vld [vmem:[#allocation3 + $0x68] sm:$0xf0]  ;;  %v1498_v4 = vld [vmem:[#allocation3 + $0x50] sm:$0xf] }
  0xd7   : > { %1549 = vmatpush.bf16.msrb.mxu3 %v1515_v56 }
  0xdd   : > { %593 = vxpose.xlu2.b32.cont [7/8] (short) %v552_v0, 128  ;;  %561 = vxpose.xlu1.b32.cont [7/8] (short) %v551_v63, 128  ;;  %v1542_v63 = vld [vmem:[#allocation3 + $0x64] sm:$0xf0]  ;;  %v1541_v0 = vld [vmem:[#allocation3 + $0x64] sm:$0xf] }
  0xde   : > { %v1507_v1 = vor.u32 %v1542_v63, %v1506_v62  ;;  %v2011_v3 = vor.u32 %v1541_v0, %v1508_v2 }
  0xe0   : > { %1028 = vmatpush.bf16.msra.mxu1 %v1507_v1  ;;  %1550 = vmatpush.bf16.msrb.mxu3 %v1507_v1 }
  0xe1   : > { %1117 = vmatpush.bf16.msra.mxu2 %v2011_v3 }
  0xe5   : > { %594 = vxpose.xlu2.b32.end [8/8] (short) %v554_v6, 128  ;;  %562 = vxpose.xlu1.b32.end [8/8] (short) %v553_v5, 128  ;;  %v1540_v5 = vld [vmem:[#allocation3 + $0x54] sm:$0xf0] }
  0xe6   : > { %v1499_v27 = vor.u32 %v1540_v5, %v1498_v4 }
  0xe8   : > { %1029 = vmatpush.bf16.msra.mxu1 %v1499_v27  ;;  %1551 = vmatpush.bf16.msrb.mxu3 %v1499_v27 }
 0x146   : > { %v1998_v43 = vpop.trf.xlu2 }
 0x147   : > { %v639_v0 = vadd.f32 %v1982_v31, %v1998_v43 }
 0x149   : > { %v671_v2 = vmax.f32 %v639_v0, 0.0 }
 0x14e   : > { %v2001_v48 = vpop.trf.xlu2 }
 0x14f   : > { %v640_v1 = vadd.f32 %v1982_v31, %v2001_v48 }
 0x151   : > { %v571_v30 = vpop.trf.xlu1  ;;  %v672_v4 = vmax.f32 %v640_v1, 0.0 }
 0x152   : > { %v623_v32 = vadd.f32 %v1982_v31, %v571_v30  ;;  %v2014_v30 = vor.u32 %v1539_v28, %v1500_v29  ;;  %v2053_v28 = vld [vmem:[%s2263_s4] ss:$0 sm:$0xff] }
 0x153   : > { %v695_v27 = vpack.c.bf16 %v672_v4, %v671_v2 }
 0x154   : > { %v655_v9 = vmax.f32 %v623_v32, 0.0  ;;  %v1490_v32 = vld [vmem:[#allocation3 + $0x40] sm:$0xf]  ;;  %1118 = vmatpush.bf16.msra.mxu2 %v2014_v30 }
 0x156   : > { %v2005_v55 = vpop.trf.xlu2 }
 0x157   : > { %v641_v48 = vadd.f32 %v1982_v31, %v2005_v55 }
 0x159   : > { %v572_v7 = vpop.trf.xlu1 }
 0x15a   : > { %v624_v8 = vadd.f32 %v1982_v31, %v572_v7  ;;  %v1538_v7 = vld [vmem:[#allocation3 + $0x44] sm:$0xf0] }
 0x15c   : > { %v656_v10 = vmax.f32 %v624_v8, 0.0 }
 0x15e   : > { %v687_v11 = vpack.c.bf16 %v656_v10, %v655_v9  ;;  %v2016_v8 = vpop.trf.xlu2  ;;  %v1537_v9 = vld [vmem:[#allocation3 + $0x44] sm:$0xf]  ;;  %v1492_v10 = vld [vmem:[#allocation3 + $0x48] sm:$0xf0] }
 0x160   : > { %1440 = vmatmul.msk.bf16.vlgmr.msra.gmra.mxu0 %vm739_vm0, %v687_v11  ;;  %v1491_v11 = vor.u32 %v1538_v7, %v1490_v32  ;;  %v642_v7 = vadd.f32 %v1982_v31, %v2016_v8 }
 0x161   : > { %v573_v13 = vpop.trf.xlu1 }
 0x162   : > { %v625_v12 = vadd.f32 %v1982_v31, %v573_v13  ;;  %v2019_v13 = vor.u32 %v1537_v9, %v1492_v10  ;;  %1030 = vmatpush.bf16.msra.mxu1 %v1491_v11  ;;  %1552 = vmatpush.bf16.msrb.mxu3 %v1491_v11 }
 0x164   : > { %v657_v16 = vmax.f32 %v625_v12, 0.0  ;;  %1119 = vmatpush.bf16.msra.mxu2 %v2019_v13 }
 0x169   : > { %v574_v14 = vpop.trf.xlu1 }
 0x16a   : > { %v626_v15 = vadd.f32 %v1982_v31, %v574_v14 }
 0x16c   : > { %v658_v18 = vmax.f32 %v626_v15, 0.0 }
 0x16e   : > { %v688_v19 = vpack.c.bf16 %v658_v18, %v657_v16  ;;  %v1482_v16 = vld [vmem:[#allocation3 + $0x30] sm:$0xf]  ;;  %v1536_v18 = vld [vmem:[#allocation3 + $0x34] sm:$0xf0] }
 0x170   : > { %1441 = vmatmul.msk.bf16.gmra.mxu0 %vm739_vm0, %v688_v19  ;;  %v1535_v19 = vld [vmem:[#allocation3 + $0x34] sm:$0xf] }
 0x171   : > { %v575_v20 = vpop.trf.xlu1 }
 0x172   : > { %v627_v21 = vadd.f32 %v1982_v31, %v575_v20  ;;  %v2024_v20 = vpop.trf.xlu2 }
 0x174   : > { %v659_v24 = vmax.f32 %v627_v21, 0.0  ;;  %v1483_v21 = vor.u32 %v1536_v18, %v1482_v16 }
 0x176   : > { %1031 = vmatpush.bf16.msra.mxu1 %v1483_v21  ;;  %1553 = vmatpush.bf16.msrb.mxu3 %v1483_v21 }
 0x179   : > { %v576_v22 = vpop.trf.xlu1 }
 0x17a   : > { %v628_v23 = vadd.f32 %v1982_v31, %v576_v22  ;;  %v1484_v22 = vld [vmem:[#allocation3 + $0x38] sm:$0xf0] }
 0x17c   : > { %v660_v25 = vmax.f32 %v628_v23, 0.0 }
 0x17e   : > { %v689_v26 = vpack.c.bf16 %v660_v25, %v659_v24  ;;  %v2026_v25 = vor.u32 %v1535_v19, %v1484_v22 }
 0x180   : > { %1442 = vmatmul.msk.bf16.gmra.mxu0 %vm739_vm0, %v689_v26  ;;  %1120 = vmatpush.bf16.msra.mxu2 %v2026_v25 }
 0x181   : > { %v577_v33 = vpop.trf.xlu1 }
 0x182   : > { %v629_v34 = vadd.f32 %v1982_v31, %v577_v33  ;;  %v1474_v33 = vld [vmem:[#allocation3 + $0x20] sm:$0xf] }
 0x184   : > { %v661_v17 = vmax.f32 %v629_v34, 0.0  ;;  %v1534_v34 = vld [vmem:[#allocation3 + $0x24] sm:$0xf0] }
 0x189   : > { %v578_v35 = vpop.trf.xlu1 }
 0x18a   : > { %v630_v36 = vadd.f32 %v1982_v31, %v578_v35  ;;  %v1475_v35 = vor.u32 %v1534_v34, %v1474_v33 }
 0x18c   : > { %v662_v37 = vmax.f32 %v630_v36, 0.0  ;;  %v1533_v36 = vld [vmem:[#allocation3 + $0x24] sm:$0xf]  ;;  %1032 = vmatpush.bf16.msra.mxu1 %v1475_v35  ;;  %1554 = vmatpush.bf16.msrb.mxu3 %v1475_v35 }
 0x18e   : > { %v690_v38 = vpack.c.bf16 %v662_v37, %v661_v17  ;;  %v1476_v17 = vld [vmem:[#allocation3 + $0x28] sm:$0xf0] }
 0x18f   : > { %v2030_v37 = vor.u32 %v1533_v36, %v1476_v17 }
 0x190   : > { %1443 = vmatmul.msk.bf16.gmra.mxu0 %vm739_vm0, %v690_v38 }
 0x191   : > { %v579_v39 = vpop.trf.xlu1  ;;  %1121 = vmatpush.bf16.msra.mxu2 %v2030_v37 }
 0x192   : > { %v631_v40 = vadd.f32 %v1982_v31, %v579_v39  ;;  %v1466_v39 = vld [vmem:[#allocation3 + $0x10] sm:$0xf] }
 0x194   : > { %v663_v44 = vmax.f32 %v631_v40, 0.0  ;;  %v1532_v40 = vld [vmem:[#allocation3 + $0x14] sm:$0xf0] }
 0x199   : > { %v580_v41 = vpop.trf.xlu1 }
 0x19a   : > { %v632_v42 = vadd.f32 %v1982_v31, %v580_v41  ;;  %v1531_v41 = vld [vmem:[#allocation3 + $0x14] sm:$0xf] }
 0x19c   : > { %v664_v45 = vmax.f32 %v632_v42, 0.0  ;;  %v608_v42 = vpop.trf.xlu2 }
 0x19d   : > { %v644_v33 = vadd.f32 %v1982_v31, %v608_v42 }
 0x19e   : > { %v691_v46 = vpack.c.bf16 %v664_v45, %v663_v44  ;;  %v1467_v44 = vor.u32 %v1532_v40, %v1466_v39  ;;  %v1468_v45 = vld [vmem:[#allocation3 + $0x18] sm:$0xf0] }
 0x19f   : > { %v676_v40 = vmax.f32 %v644_v33, 0.0 }
 0x1a0   : > { %1444 = vmatmul.msk.bf16.gmra.mxu0 %vm739_vm0, %v691_v46  ;;  %v2033_v46 = vor.u32 %v1531_v41, %v1468_v45  ;;  %1033 = vmatpush.bf16.msra.mxu1 %v1467_v44 }
 0x1a1   : > { %v581_v47 = vpop.trf.xlu1  ;;  %1555 = vmatpush.bf16.msrb.mxu3 %v1467_v44 }
 0x1a2   : > { %v633_v49 = vadd.f32 %v1982_v31, %v581_v47  ;;  %1122 = vmatpush.bf16.msra.mxu2 %v2033_v46  ;;  %v1458_v47 = vld [vmem:[#allocation3] sm:$0xf] }
 0x1a4   : > { %v665_v58 = vmax.f32 %v633_v49, 0.0  ;;  %v1530_v49 = vld [vmem:[#allocation3 + $0x4] sm:$0xf0] }
 0x1a9   : > { %v582_v50 = vpop.trf.xlu1 }
 0x1aa   : > { %v634_v51 = vadd.f32 %v1982_v31, %v582_v50  ;;  %v1459_v50 = vor.u32 %v1530_v49, %v1458_v47 }
 0x1ac   : > { %v666_v59 = vmax.f32 %v634_v51, 0.0  ;;  %v1529_v51 = vld [vmem:[#allocation3 + $0x4] sm:$0xf]  ;;  %1034 = vmatpush.bf16.msra.mxu1 %v1459_v50  ;;  %1556 = vmatpush.bf16.msrb.mxu3 %v1459_v50 }
 0x1ad   : > { %v2037_v54 = vor.u32 %v1529_v51, %v1460_v52 }
 0x1ae   : > { %v692_v61 = vpack.c.bf16 %v666_v59, %v665_v58  ;;  %v2041_v58 = vpop.trf.xlu2 }
 0x1af   : > { %1123 = vmatpush.bf16.msra.mxu2 %v2037_v54 }
 0x1b0   : > { %1445 = vmatmul.msk.bf16.gmra.mxu0 %vm739_vm0, %v692_v61 }
 0x1b1   : > { %v583_v6 = vpop.trf.xlu1 }
 0x1b2   : > { %v635_v12 = vadd.f32 %v1982_v31, %v583_v6 }
 0x1b4   : > { %v667_v23 = vmax.f32 %v635_v12, 0.0  ;;  %v673_v12 = vmax.f32 %v641_v48, 0.0 }
 0x1b6   : > { %v610_v63 = vpop.trf.xlu2 }
 0x1b9   : > { %v584_v14 = vpop.trf.xlu1 }
 0x1ba   : > { %v636_v15 = vadd.f32 %v1982_v31, %v584_v14  ;;  %v674_v14 = vmax.f32 %v642_v7, 0.0 }
 0x1bc   : > { %v668_v24 = vmax.f32 %v636_v15, 0.0  ;;  %v696_v19 = vpack.c.bf16 %v674_v14, %v673_v12 }
 0x1be   : > { %v693_v26 = vpack.c.bf16 %v668_v24, %v667_v23  ;;  %v2048_v5 = vpop.trf.xlu2 }
 0x1c0   : > { %1446 = vmatmul.msk.bf16.gmra.mxu0 %vm739_vm0, %v693_v26  ;;  %v643_v26 = vadd.f32 %v1982_v31, %v2024_v20 }
 0x1c1   : > { %v585_v38 = vpop.trf.xlu1 }
 0x1c2   : > { %v637_v53 = vadd.f32 %v1982_v31, %v585_v38  ;;  %v675_v39 = vmax.f32 %v643_v26, 0.0 }
 0x1c4   : > { %v669_v59 = vmax.f32 %v637_v53, 0.0  ;;  %v697_v20 = vpack.c.bf16 %v676_v40, %v675_v39  ;;  %v646_v53 = vadd.f32 %v1982_v31, %v610_v63 }
 0x1c6   : > { %v2056_v29 = vpop.trf.xlu2 }
 0x1c9   : > { %v586_v56 = vpop.trf.xlu1 }
 0x1ca   : > { %v638_v57 = vadd.f32 %v1982_v31, %v586_v56 }
 0x1cc   : > { %v670_v61 = vmax.f32 %v638_v57, 0.0 }
 0x1ce   : > { %v694_v62 = vpack.c.bf16 %v670_v61, %v669_v59  ;;  %v613_v16 = vpop.trf.xlu2 }
 0x1cf   : > { %v649_v21 = vadd.f32 %v1982_v31, %v613_v16 }
 0x1d0   : > { %1447 = vmatmul.msk.bf16.gmra.mxu0 %vm739_vm0, %v694_v62  ;;  %v678_v62 = vmax.f32 %v646_v53, 0.0 }
 0x1d1   : > { %v681_v8 = vmax.f32 %v649_v21, 0.0 }
 0x1d6   : > { %v614_v55 = vpop.trf.xlu2 }
 0x1d7   : > { %v650_v23 = vadd.f32 %v1982_v31, %v614_v55 }
 0x1d9   : > { %v682_v35 = vmax.f32 %v650_v23, 0.0 }
 0x1db   : > { %v700_v38 = vpack.c.bf16 %v682_v35, %v681_v8 }
 0x1dd   : > { %v797_v6 = vpop.f32.mrf.mxu0  ;;  %1453 = vmatmul.msk.bf16.vlgmr.msra.gmra.mxu3 %vm739_vm0, %v700_v38 }
 0x1de   : > { %v798_v43 = vadd.f32 %v2053_v28, %v797_v6  ;;  %v615_v44 = vpop.trf.xlu2  ;;  %1557 = vmatpush.bf16.msra.mxu3 %v2007_v60  ;;  %v645_v60 = vadd.f32 %v1982_v31, %v2041_v58 }
 0x1df   : > { %v651_v42 = vadd.f32 %v1982_v31, %v615_v44 }
 0x1e0   : > { %1448 = vmatmul.msk.bf16.gmra.mxu0 %vm739_vm0, %v695_v27  ;;  %v877_v10 = vmax.f32 %v798_v43, 0.0 }
 0x1e1   : > { %v683_v50 = vmax.f32 %v651_v42, 0.0 }
 0x1e2   : > { %1558 = vmatpush.bf16.msra.mxu3 %v2011_v3 }
 0x1e5   : > { %v799_v32 = vpop.f32.mrf.mxu0 }
 0x1e6   : > { %v800_v9 = vadd.f32 %v2053_v28, %v799_v32  ;;  %v616_v47 = vpop.trf.xlu2  ;;  %1559 = vmatpush.bf16.msra.mxu3 %v2014_v30  ;;  %v677_v30 = vmax.f32 %v645_v60, 0.0  ;;  %v648_v32 = vadd.f32 %v1982_v31, %v2056_v29 }
 0x1e7   : > { %v652_v51 = vadd.f32 %v1982_v31, %v616_v47 }
 0x1e8   : > { %v878_v11 = vmax.f32 %v800_v9, 0.0  ;;  %v698_v63 = vpack.c.bf16 %v678_v62, %v677_v30 }
 0x1e9   : > { %v684_v56 = vmax.f32 %v652_v51, 0.0 }
 0x1ea   : > { %v909_v15 = vpack.c.bf16 %v878_v11, %v877_v10  ;;  %1560 = vmatpush.bf16.msra.mxu3 %v2019_v13  ;;  %v680_v11 = vmax.f32 %v648_v32, 0.0 }
 0x1eb   : > { %v701_v61 = vpack.c.bf16 %v684_v56, %v683_v50 }
 0x1ec   : > { %1035 = vmatmul.bf16.vlgmr.msra.gmra.mxu1 %v909_v15  ;;  %1124 = vmatmul.bf16.vlgmr.msra.gmra.mxu2 %v909_v15 }
 0x1ed   : > { %v802_v18 = vpop.f32.mrf.mxu0  ;;  %1454 = vmatmul.msk.bf16.gmra.mxu3 %vm739_vm0, %v701_v61  ;;  %v941_v61 = vld [vmem:[%s2265_s6] sm:$0x3] }
 0x1ee   : > { %v803_v22 = vadd.f32 %v2053_v28, %v802_v18  ;;  %v617_v1 = vpop.trf.xlu2  ;;  %1561 = vmatpush.bf16.msra.mxu3 %v2026_v25  ;;  %v647_v25 = vadd.f32 %v1982_v31, %v2048_v5 }
 0x1ef   : > { %v653_v13 = vadd.f32 %v1982_v31, %v617_v1 }
 0x1f0   : > { %1449 = vmatmul.msk.bf16.gmra.mxu0 %vm739_vm0, %v696_v19  ;;  %v879_v36 = vmax.f32 %v803_v22, 0.0  ;;  %v679_v10 = vmax.f32 %v647_v25, 0.0 }
 0x1f1   : > { %v685_v6 = vmax.f32 %v653_v13, 0.0 }
 0x1f2   : > { %1562 = vmatpush.bf16.msra.mxu3 %v2030_v37  ;;  %v699_v5 = vpack.c.bf16 %v680_v11, %v679_v10 }
 0x1f5   : > { %v804_v24 = vpop.f32.mrf.mxu0 }
 0x1f6   : > { %v805_v34 = vadd.f32 %v2053_v28, %v804_v24  ;;  %v618_v2 = vpop.trf.xlu2  ;;  %1563 = vmatpush.bf16.msra.mxu3 %v2033_v46 }
 0x1f7   : > { %v654_v27 = vadd.f32 %v1982_v31, %v618_v2 }
 0x1f8   : > { %v880_v17 = vmax.f32 %v805_v34, 0.0 }
 0x1f9   : > { %v686_v48 = vmax.f32 %v654_v27, 0.0 }
 0x1fa   : > { %v910_v41 = vpack.c.bf16 %v880_v17, %v879_v36  ;;  %1564 = vmatpush.bf16.msra.mxu3 %v2037_v54 }
 0x1fb   : > { %v702_v46 = vpack.c.bf16 %v686_v48, %v685_v6 }
 0x1fc   : > { %1040 = vmatmul.bf16.gmra.mxu1 %v910_v41  ;;  %1129 = vmatmul.bf16.gmra.mxu2 %v910_v41 }
 0x1fd   : > { %v807_v45 = vpop.f32.mrf.mxu0  ;;  %1455 = vmatmul.msk.bf16.gmra.mxu3 %vm739_vm0, %v702_v46 }
 0x1fe   : > { %v808_v49 = vadd.f32 %v2053_v28, %v807_v45 }
 0x200   : > { %1450 = vmatmul.msk.bf16.gmra.mxu0 %vm739_vm0, %v697_v20  ;;  %v881_v57 = vmax.f32 %v808_v49, 0.0 }
 0x205   : > { %v809_v52 = vpop.f32.mrf.mxu0 }
 0x206   : > { %v810_v3 = vadd.f32 %v2053_v28, %v809_v52 }
 0x208   : > { %v882_v59 = vmax.f32 %v810_v3, 0.0 }
 0x20a   : > { %v911_v0 = vpack.c.bf16 %v882_v59, %v881_v57 }
 0x20c   : > { %1045 = vmatmul.bf16.gmra.mxu1 %v911_v0  ;;  %1134 = vmatmul.bf16.gmra.mxu2 %v911_v0  ;;  %v2115_v0 = vperm.slane %v941_v61, 0 }
 0x20d   : > { %v812_v58 = vpop.f32.mrf.mxu0 }
 0x20e   : > { %v813_v4 = vadd.f32 %v2053_v28, %v812_v58 }
 0x210   : > { %1451 = vmatmul.msk.bf16.gmra.mxu0 %vm739_vm0, %v698_v63  ;;  %v883_v7 = vmax.f32 %v813_v4, 0.0 }
 0x215   : > { %v814_v43 = vpop.f32.mrf.mxu0 }
 0x216   : > { %v815_v37 = vadd.f32 %v2053_v28, %v814_v43  ;;  %v2120_v43 = vperm.slane %v941_v61, 1 }
 0x218   : > { %v884_v9 = vmax.f32 %v815_v37, 0.0 }
 0x21a   : > { %v912_v12 = vpack.c.bf16 %v884_v9, %v883_v7 }
 0x21c   : > { %1050 = vmatmul.bf16.gmra.mxu1 %v912_v12  ;;  %1139 = vmatmul.bf16.gmra.mxu2 %v912_v12 }
 0x21d   : > { %v817_v14 = vpop.f32.mrf.mxu0 }
 0x21e   : > { %v818_v31 = vadd.f32 %v2053_v28, %v817_v14 }
 0x220   : > { %1452 = vmatmul.msk.bf16.gmra.mxu0 %vm739_vm0, %v699_v5  ;;  %v885_v54 = vmax.f32 %v818_v31, 0.0 }
 0x225   : > { %v819_v29 = vpop.f32.mrf.mxu0 }
 0x226   : > { %v820_v15 = vadd.f32 %v2053_v28, %v819_v29 }
 0x228   : > { %v886_v16 = vmax.f32 %v820_v15, 0.0 }
 0x22a   : > { %v913_v18 = vpack.c.bf16 %v886_v16, %v885_v54 }
 0x22c   : > { %1055 = vmatmul.bf16.gmra.mxu1 %v913_v18  ;;  %1144 = vmatmul.bf16.gmra.mxu2 %v913_v18 }
 0x22d   : > { %v822_v19 = vpop.f32.mrf.mxu0 }
 0x22e   : > { %v823_v21 = vadd.f32 %v2053_v28, %v822_v19 }
 0x230   : > { %v887_v8 = vmax.f32 %v823_v21, 0.0 }
 0x235   : > { %v824_v55 = vpop.f32.mrf.mxu0 }
 0x236   : > { %v825_v22 = vadd.f32 %v2053_v28, %v824_v55 }
 0x238   : > { %v888_v23 = vmax.f32 %v825_v22, 0.0 }
 0x23a   : > { %v914_v24 = vpack.c.bf16 %v888_v23, %v887_v8 }
 0x23c   : > { %1060 = vmatmul.bf16.gmra.mxu1 %v914_v24  ;;  %1149 = vmatmul.bf16.gmra.mxu2 %v914_v24 }
 0x23d   : > { %v827_v26 = vpop.f32.mrf.mxu0 }
 0x23e   : > { %v828_v33 = vadd.f32 %v2053_v28, %v827_v26 }
 0x240   : > { %v889_v36 = vmax.f32 %v828_v33, 0.0 }
 0x245   : > { %v829_v34 = vpop.f32.mrf.mxu0 }
 0x246   : > { %v830_v35 = vadd.f32 %v2053_v28, %v829_v34 }
 0x248   : > { %v890_v17 = vmax.f32 %v830_v35, 0.0 }
 0x24a   : > { %v915_v38 = vpack.c.bf16 %v890_v17, %v889_v36 }
 0x24c   : > { %1065 = vmatmul.bf16.gmra.mxu1 %v915_v38  ;;  %1154 = vmatmul.bf16.gmra.mxu2 %v915_v38 }
 0x24d   : > { %v832_v39 = vpop.f32.mrf.mxu0 }
 0x24e   : > { %v833_v40 = vadd.f32 %v2053_v28, %v832_v39 }
 0x250   : > { %v891_v45 = vmax.f32 %v833_v40, 0.0 }
 0x255   : > { %v834_v41 = vpop.f32.mrf.mxu0 }
 0x256   : > { %v835_v44 = vadd.f32 %v2053_v28, %v834_v41 }
 0x258   : > { %v892_v20 = vmax.f32 %v835_v44, 0.0 }
 0x25a   : > { %v916_v42 = vpack.c.bf16 %v892_v20, %v891_v45 }
 0x25c   : > { %1070 = vmatmul.bf16.gmra.mxu1 %v916_v42  ;;  %1159 = vmatmul.bf16.gmra.mxu2 %v916_v42 }
 0x25d   : > { %v837_v47 = vpop.f32.mrf.mxu0 }
 0x25e   : > { %v838_v49 = vadd.f32 %v2053_v28, %v837_v47 }
 0x260   : > { %v893_v52 = vmax.f32 %v838_v49, 0.0 }
 0x265   : > { %v839_v50 = vpop.f32.mrf.mxu0 }
 0x266   : > { %v840_v51 = vadd.f32 %v2053_v28, %v839_v50 }
 0x268   : > { %v894_v60 = vmax.f32 %v840_v51, 0.0 }
 0x269   : > { %v1036_v53 = vpop.f32.mrf.mxu1 }
 0x26a   : > { %v917_v3 = vpack.c.bf16 %v894_v60, %v893_v52  ;;  %v1037_v4 = vadd.f32 %v1036_v53, %v2115_v0  ;;  %v862_v52 = vpop.f32.mrf.mxu3 }
 0x26c   : > { %1075 = vmatmul.bf16.gmra.mxu1 %v917_v3  ;;  %1164 = vmatmul.bf16.gmra.mxu2 %v917_v3 }
 0x26d   : > { %v842_v56 = vpop.f32.mrf.mxu0 }
 0x26e   : > { %v843_v30 = vadd.f32 %v2053_v28, %v842_v56 }
 0x26f   : > { %v1125_v57 = vpop.f32.mrf.mxu2 }
 0x270   : > { %v895_v63 = vmax.f32 %v843_v30, 0.0  ;;  %v1126_v48 = vadd.f32 %v1125_v57, %v2120_v43 }
 0x271   : > { %v1038_v59 = vpop.f32.mrf.mxu1 }
 0x272   : > { %v1039_v46 = vadd.f32 %v1038_v59, %v2115_v0 }
 0x275   : > { %v844_v62 = vpop.f32.mrf.mxu0 }
 0x276   : > { %v845_v1 = vadd.f32 %v2053_v28, %v844_v62 }
 0x277   : > { %v1127_v58 = vpop.f32.mrf.mxu2 }
 0x278   : > { %v896_v13 = vmax.f32 %v845_v1, 0.0  ;;  %v1128_v15 = vadd.f32 %v1127_v58, %v2120_v43  ;;  %v864_v1 = vpop.f32.mrf.mxu3 }
 0x279   : > { %v1041_v2 = vpop.f32.mrf.mxu1 }
 0x27a   : > { %v1042_v6 = vadd.f32 %v1041_v2, %v2115_v0  ;;  %v918_v27 = vpack.c.bf16 %v896_v13, %v895_v63 }
 0x27c   : > { %v1205_v25 = vmax.f32 %v1037_v4, %v1042_v6  ;;  %1080 = vmatmul.bf16.gmra.mxu1 %v918_v27  ;;  %1169 = vmatmul.bf16.gmra.mxu2 %v918_v27 }
 0x27d   : > { %v847_v32 = vpop.f32.mrf.mxu0 }
 0x27e   : > { %v848_v12 = vadd.f32 %v2053_v28, %v847_v32 }
 0x27f   : > { %v1130_v37 = vpop.f32.mrf.mxu2 }
 0x280   : > { %v1131_v7 = vadd.f32 %v1130_v37, %v2120_v43  ;;  %v897_v54 = vmax.f32 %v848_v12, 0.0 }
 0x281   : > { %v1043_v9 = vpop.f32.mrf.mxu1 }
 0x282   : > { %v1242_v10 = vmax.f32 %v1126_v48, %v1131_v7  ;;  %v1044_v11 = vadd.f32 %v1043_v9, %v2115_v0  ;;  %v867_v7 = vpop.f32.mrf.mxu3 }
 0x284   : > { %v1206_v14 = vmax.f32 %v1039_v46, %v1044_v11  ;;  %v863_v46 = vadd.f32 %v2053_v28, %v862_v52 }
 0x285   : > { %v849_v5 = vpop.f32.mrf.mxu0 }
 0x286   : > { %v850_v31 = vadd.f32 %v2053_v28, %v849_v5  ;;  %v903_v5 = vmax.f32 %v863_v46, 0.0 }
 0x287   : > { %v1132_v29 = vpop.f32.mrf.mxu2 }
 0x288   : > { %v898_v16 = vmax.f32 %v850_v31, 0.0  ;;  %v1133_v18 = vadd.f32 %v1132_v29, %v2120_v43 }
 0x289   : > { %v1046_v19 = vpop.f32.mrf.mxu1 }
 0x28a   : > { %v1243_v21 = vmax.f32 %v1128_v15, %v1133_v18  ;;  %v1047_v55 = vadd.f32 %v1046_v19, %v2115_v0  ;;  %v919_v22 = vpack.c.bf16 %v898_v16, %v897_v54 }
 0x28c   : > { %v1207_v8 = vmax.f32 %v1205_v25, %v1047_v55  ;;  %1085 = vmatmul.bf16.gmra.mxu1 %v919_v22  ;;  %1174 = vmatmul.bf16.gmra.mxu2 %v919_v22 }
 0x28d   : > { %v852_v23 = vpop.f32.mrf.mxu0 }
 0x28e   : > { %v853_v36 = vadd.f32 %v2053_v28, %v852_v23 }
 0x28f   : > { %v1135_v24 = vpop.f32.mrf.mxu2 }
 0x290   : > { %v1136_v26 = vadd.f32 %v1135_v24, %v2120_v43  ;;  %v899_v41 = vmax.f32 %v853_v36, 0.0  ;;  %v868_v24 = vadd.f32 %v2053_v28, %v867_v7 }
 0x291   : > { %v1048_v33 = vpop.f32.mrf.mxu1 }
 0x292   : > { %v1244_v34 = vmax.f32 %v1242_v10, %v1136_v26  ;;  %v1049_v35 = vadd.f32 %v1048_v33, %v2115_v0  ;;  %v865_v10 = vadd.f32 %v2053_v28, %v864_v1 }
 0x294   : > { %v1208_v17 = vmax.f32 %v1206_v14, %v1049_v35  ;;  %v904_v31 = vmax.f32 %v865_v10, 0.0 }
 0x295   : > { %v854_v38 = vpop.f32.mrf.mxu0 }
 0x296   : > { %v855_v39 = vadd.f32 %v2053_v28, %v854_v38  ;;  %v922_v19 = vpack.c.bf16 %v904_v31, %v903_v5 }
 0x297   : > { %v1137_v40 = vpop.f32.mrf.mxu2 }
 0x298   : > { %v900_v44 = vmax.f32 %v855_v39, 0.0  ;;  %v1138_v45 = vadd.f32 %v1137_v40, %v2120_v43 }
 0x299   : > { %v1051_v20 = vpop.f32.mrf.mxu1 }
 0x29a   : > { %v1245_v42 = vmax.f32 %v1243_v21, %v1138_v45  ;;  %v1052_v47 = vadd.f32 %v1051_v20, %v2115_v0  ;;  %v920_v49 = vpack.c.bf16 %v900_v44, %v899_v41  ;;  %v869_v21 = vpop.f32.mrf.mxu3 }
 0x29b   : > { %v870_v26 = vadd.f32 %v2053_v28, %v869_v21 }
 0x29c   : > { %v1209_v50 = vmax.f32 %v1207_v8, %v1052_v47  ;;  %1090 = vmatmul.bf16.gmra.mxu1 %v920_v49  ;;  %1179 = vmatmul.bf16.gmra.mxu2 %v920_v49 }
 0x29d   : > { %v857_v51 = vpop.f32.mrf.mxu0  ;;  %v906_v38 = vmax.f32 %v870_v26, 0.0 }
 0x29e   : > { %v858_v59 = vadd.f32 %v2053_v28, %v857_v51 }
 0x29f   : > { %v1140_v60 = vpop.f32.mrf.mxu2 }
 0x2a0   : > { %v1141_v53 = vadd.f32 %v1140_v60, %v2120_v43  ;;  %v901_v63 = vmax.f32 %v858_v59, 0.0 }
 0x2a1   : > { %v1053_v3 = vpop.f32.mrf.mxu1 }
 0x2a2   : > { %v1246_v56 = vmax.f32 %v1244_v34, %v1141_v53  ;;  %v1054_v57 = vadd.f32 %v1053_v3, %v2115_v0  ;;  %v872_v36 = vpop.f32.mrf.mxu3 }
 0x2a3   : > { %v873_v52 = vadd.f32 %v2053_v28, %v872_v36 }
 0x2a4   : > { %v1210_v61 = vmax.f32 %v1208_v17, %v1054_v57  ;;  %v905_v17 = vmax.f32 %v868_v24, 0.0 }
 0x2a5   : > { %v859_v30 = vpop.f32.mrf.mxu0  ;;  %v907_v57 = vmax.f32 %v873_v52, 0.0 }
 0x2a6   : > { %v860_v62 = vadd.f32 %v2053_v28, %v859_v30  ;;  %v923_v20 = vpack.c.bf16 %v906_v38, %v905_v17 }
 0x2a7   : > { %v1142_v58 = vpop.f32.mrf.mxu2 }
 0x2a8   : > { %v902_v13 = vmax.f32 %v860_v62, 0.0  ;;  %v1143_v2 = vadd.f32 %v1142_v58, %v2120_v43 }
 0x2a9   : > { %v1056_v4 = vpop.f32.mrf.mxu1 }
 0x2aa   : > { %v2142_v6 = vpack.c.bf16 %v902_v13, %v901_v63  ;;  %v1247_v27 = vmax.f32 %v1245_v42, %v1143_v2  ;;  %v1057_v25 = vadd.f32 %v1056_v4, %v2115_v0  ;;  %v874_v47 = vpop.f32.mrf.mxu3 }
 0x2ab   : > { %v875_v60 = vadd.f32 %v2053_v28, %v874_v47 }
 0x2ac   : > { %v1211_v32 = vmax.f32 %v1209_v50, %v1057_v25  ;;  %1095 = vmatmul.bf16.vlgmr.msrb.gmra.mxu3 %v2142_v6 }
 0x2ad   : > { %v908_v59 = vmax.f32 %v875_v60, 0.0 }
 0x2af   : > { %v1145_v37 = vpop.f32.mrf.mxu2  ;;  %v924_v63 = vpack.c.bf16 %v908_v59, %v907_v57 }
 0x2b0   : > { %v1146_v48 = vadd.f32 %v1145_v37, %v2120_v43 }
 0x2b1   : > { %v1058_v9 = vpop.f32.mrf.mxu1 }
 0x2b2   : > { %v1248_v11 = vmax.f32 %v1246_v56, %v1146_v48  ;;  %v1059_v12 = vadd.f32 %v1058_v9, %v2115_v0 }
 0x2b4   : > { %v1212_v14 = vmax.f32 %v1210_v61, %v1059_v12 }
 0x2b7   : > { %v1147_v29 = vpop.f32.mrf.mxu2 }
 0x2b8   : > { %v1148_v15 = vadd.f32 %v1147_v29, %v2120_v43 }
 0x2b9   : > { %v1061_v54 = vpop.f32.mrf.mxu1 }
 0x2ba   : > { %v1249_v16 = vmax.f32 %v1247_v27, %v1148_v15  ;;  %v1062_v18 = vadd.f32 %v1061_v54, %v2115_v0 }
 0x2bc   : > { %v1213_v55 = vmax.f32 %v1211_v32, %v1062_v18  ;;  %1100 = vmatmul.bf16.gmra.mxu3 %v922_v19 }
 0x2bf   : > { %v1150_v22 = vpop.f32.mrf.mxu2 }
 0x2c0   : > { %v1151_v8 = vadd.f32 %v1150_v22, %v2120_v43 }
 0x2c1   : > { %v1063_v23 = vpop.f32.mrf.mxu1 }
 0x2c2   : > { %v1250_v33 = vmax.f32 %v1248_v11, %v1151_v8  ;;  %v1064_v34 = vadd.f32 %v1063_v23, %v2115_v0 }
 0x2c4   : > { %v1214_v35 = vmax.f32 %v1212_v14, %v1064_v34 }
 0x2c7   : > { %v1152_v39 = vpop.f32.mrf.mxu2 }
 0x2c8   : > { %v1153_v40 = vadd.f32 %v1152_v39, %v2120_v43 }
 0x2c9   : > { %v1066_v41 = vpop.f32.mrf.mxu1 }
 0x2ca   : > { %v1251_v44 = vmax.f32 %v1249_v16, %v1153_v40  ;;  %v1067_v45 = vadd.f32 %v1066_v41, %v2115_v0 }
 0x2cc   : > { %v1215_v42 = vmax.f32 %v1213_v55, %v1067_v45  ;;  %1105 = vmatmul.bf16.gmra.mxu3 %v923_v20 }
 0x2cf   : > { %v1155_v49 = vpop.f32.mrf.mxu2 }
 0x2d0   : > { %v1156_v50 = vadd.f32 %v1155_v49, %v2120_v43 }
 0x2d1   : > { %v1068_v51 = vpop.f32.mrf.mxu1 }
 0x2d2   : > { %v2161_v53 = vmax.f32 %v1250_v33, %v1156_v50  ;;  %v1069_v3 = vadd.f32 %v1068_v51, %v2115_v0 }
 0x2d4   : > { %v1216_v56 = vmax.f32 %v1214_v35, %v1069_v3 }
 0x2d7   : > { %v1157_v61 = vpop.f32.mrf.mxu2 }
 0x2d8   : > { %v1158_v30 = vadd.f32 %v1157_v61, %v2120_v43 }
 0x2d9   : > { %v1071_v62 = vpop.f32.mrf.mxu1 }
 0x2da   : > { %v2165_v1 = vmax.f32 %v1251_v44, %v1158_v30  ;;  %v1072_v58 = vadd.f32 %v1071_v62, %v2115_v0 }
 0x2dc   : > { %v1217_v13 = vmax.f32 %v1215_v42, %v1072_v58  ;;  %1110 = vmatmul.bf16.gmra.mxu3 %v924_v63 }
 0x2df   : > { %v1160_v2 = vpop.f32.mrf.mxu2 }
 0x2e0   : > { %v2169_v28 = vadd.f32 %v1160_v2, %v2120_v43 }
 0x2e1   : > { %v1073_v4 = vpop.f32.mrf.mxu1 }
 0x2e2   : > { %v1254_v27 = vmax.f32 %v2161_v53, %v2169_v28  ;;  %v1074_v5 = vadd.f32 %v1073_v4, %v2115_v0 }
 0x2e4   : > { %v1218_v16 = vmax.f32 %v1216_v56, %v1074_v5 }
 0x2e9   : > { %v1076_v25 = vpop.f32.mrf.mxu1 }
 0x2ea   : > { %v1077_v46 = vadd.f32 %v1076_v25, %v2115_v0 }
 0x2ec   : > { %1184 = vmatmul.bf16.vlgmr.msra.gmra.mxu3 %v2142_v6  ;;  %v1219_v12 = vmax.f32 %v1217_v13, %v1077_v46  ;;  %v1283_v46 = vlaneseq }
 0x2ee   : > { %vm2191_vm1 = vcmp.lt.s32.totalorder %v1283_v46, 256 }
 0x2f1   : > { %v1078_v32 = vpop.f32.mrf.mxu1 }
 0x2f2   : > { %v1079_v29 = vadd.f32 %v1078_v32, %v2115_v0 }
 0x2f4   : > { %v1220_v22 = vmax.f32 %v1218_v16, %v1079_v29 }
 0x2f9   : > { %v1081_v37 = vpop.f32.mrf.mxu1 }
 0x2fa   : > { %v1082_v11 = vadd.f32 %v1081_v37, %v2115_v0 }
 0x2fc   : > { %1189 = vmatmul.bf16.gmra.mxu3 %v922_v19  ;;  %v1221_v31 = vmax.f32 %v1219_v12, %v1082_v11  ;;  %v1775_v11 = vmov -inf  }
 0x2fd   : > { %1287 = vst.msk [vmem:[#allocation2] sm:$0x3] %vm2191_vm1, %v1775_v11 }
 0x301   : > { %v1083_v48 = vpop.f32.mrf.mxu1 }
 0x302   : > { %v1084_v18 = vadd.f32 %v1083_v48, %v2115_v0 }
 0x304   : > { %v1222_v24 = vmax.f32 %v1220_v22, %v1084_v18 }
 0x309   : > { %v1086_v7 = vpop.f32.mrf.mxu1 }
 0x30a   : > { %v1087_v14 = vadd.f32 %v1086_v7, %v2115_v0 }
 0x30c   : > { %1194 = vmatmul.bf16.gmra.mxu3 %v923_v20  ;;  %v1223_v15 = vmax.f32 %v1221_v31, %v1087_v14  ;;  %v1162_v20 = vpop.f32.mrf.mxu2 }
 0x311   : > { %v1088_v9 = vpop.f32.mrf.mxu1 }
 0x312   : > { %v1089_v8 = vadd.f32 %v1088_v9, %v2115_v0 }
 0x314   : > { %v1224_v33 = vmax.f32 %v1222_v24, %v1089_v8  ;;  %v1165_v50 = vpop.f32.mrf.mxu2 }
 0x315   : > { %v1166_v14 = vadd.f32 %v1165_v50, %v2120_v43 }
 0x319   : > { %v1091_v10 = vpop.f32.mrf.mxu1 }
 0x31a   : > { %v1092_v6 = vadd.f32 %v1091_v10, %v2115_v0 }
 0x31c   : > { %1199 = vmatmul.bf16.gmra.mxu3 %v924_v63  ;;  %v1225_v19 = vmax.f32 %v1223_v15, %v1092_v6  ;;  %v1167_v3 = vpop.f32.mrf.mxu2 }
 0x31d   : > { %v1168_v5 = vadd.f32 %v1167_v3, %v2120_v43 }
 0x321   : > { %v1093_v55 = vpop.f32.mrf.mxu1 }
 0x322   : > { %v1094_v26 = vadd.f32 %v1093_v55, %v2115_v0 }
 0x324   : > { %v1226_v35 = vmax.f32 %v1224_v33, %v1094_v26  ;;  %v1170_v62 = vpop.f32.mrf.mxu2 }
 0x325   : > { %v1171_v6 = vadd.f32 %v1170_v62, %v2120_v43 }
 0x32c   : > { %v1172_v2 = vpop.f32.mrf.mxu2 }
 0x32d   : > { %v1173_v29 = vadd.f32 %v1172_v2, %v2120_v43 }
 0x32f   : > { %v1096_v54 = vpop.f32.mrf.mxu3 }
 0x330   : > { %v1097_v21 = vadd.f32 %v1096_v54, %v2115_v0  ;;  %v1256_v54 = vmax.f32 %v1254_v27, %v1166_v14 }
 0x332   : > { %v1227_v23 = vmax.f32 %v1225_v19, %v1097_v21  ;;  %v1258_v21 = vmax.f32 %v1256_v54, %v1171_v6 }
 0x334   : > { %v1175_v25 = vpop.f32.mrf.mxu2 }
 0x335   : > { %v1176_v18 = vadd.f32 %v1175_v25, %v2120_v43 }
 0x337   : > { %v1098_v34 = vpop.f32.mrf.mxu3 }
 0x338   : > { %v1099_v36 = vadd.f32 %v1098_v34, %v2115_v0 }
 0x33a   : > { %v1228_v17 = vmax.f32 %v1226_v35, %v1099_v36 }
 0x33c   : > { %v1177_v37 = vpop.f32.mrf.mxu2 }
 0x33d   : > { %v1178_v19 = vadd.f32 %v1177_v37, %v2120_v43 }
 0x33f   : > { %v1101_v38 = vpop.f32.mrf.mxu3 }
 0x340   : > { %v1102_v39 = vadd.f32 %v1101_v38, %v2115_v0 }
 0x342   : > { %v1229_v40 = vmax.f32 %v1227_v23, %v1102_v39  ;;  %v1260_v23 = vmax.f32 %v1258_v21, %v1176_v18 }
 0x344   : > { %v1180_v9 = vpop.f32.mrf.mxu2 }
 0x345   : > { %v1181_v22 = vadd.f32 %v1180_v9, %v2120_v43 }
 0x347   : > { %v1103_v41 = vpop.f32.mrf.mxu3  ;;  %v1262_v53 = vmax.f32 %v1260_v23, %v1181_v22 }
 0x348   : > { %v1104_v44 = vadd.f32 %v1103_v41, %v2115_v0 }
 0x34a   : > { %v1230_v45 = vmax.f32 %v1228_v17, %v1104_v44 }
 0x34c   : > { %v1182_v15 = vpop.f32.mrf.mxu2 }
 0x34f   : > { %v1106_v42 = vpop.f32.mrf.mxu3 }
 0x350   : > { %v1107_v47 = vadd.f32 %v1106_v42, %v2115_v0 }
 0x352   : > { %v1231_v49 = vmax.f32 %v1229_v40, %v1107_v47 }
 0x357   : > { %v1108_v51 = vpop.f32.mrf.mxu3 }
 0x358   : > { %v1109_v52 = vadd.f32 %v1108_v51, %v2115_v0 }
 0x35a   : > { %v1232_v60 = vmax.f32 %v1230_v45, %v1109_v52 }
 0x35f   : > { %v1111_v56 = vpop.f32.mrf.mxu3 }
 0x360   : > { %v1112_v57 = vadd.f32 %v1111_v56, %v2115_v0 }
 0x362   : > { %v1233_v59 = vmax.f32 %v1231_v49, %v1112_v57 }
 0x367   : > { %v1113_v61 = vpop.f32.mrf.mxu3 }
 0x368   : > { %v1114_v30 = vadd.f32 %v1113_v61, %v2115_v0  ;;  %v1163_v0 = vadd.f32 %v1162_v20, %v2120_v43 }
 0x36a   : > { %v1234_v58 = vmax.f32 %v1232_v60, %v1114_v30  ;;  %v1255_v31 = vmax.f32 %v2165_v1, %v1163_v0  ;;  %v1183_v1 = vadd.f32 %v1182_v15, %v2120_v43 }
 0x36c   : > { %v1235_v63 = vmax.f32 %v1233_v59, %v1234_v58  ;;  %v1257_v16 = vmax.f32 %v1255_v31, %v1168_v5 }
 0x36e   : > { %v1259_v55 = vmax.f32 %v1257_v16, %v1173_v29  ;;  %v1236_v39 = vrot.slane %v1235_v63, 4 }
 0x36f   : > { %v1185_v13 = vpop.f32.mrf.mxu3 }
 0x370   : > { %v1261_v24 = vmax.f32 %v1259_v55, %v1178_v19  ;;  %v1186_v26 = vadd.f32 %v1185_v13, %v2120_v43  ;;  %v1237_v49 = vmax.f32 %v1235_v63, %v1236_v39 }
 0x372   : > { %v1263_v28 = vmax.f32 %v1261_v24, %v1183_v1  ;;  %v1264_v35 = vmax.f32 %v1262_v53, %v1186_v26  ;;  %v1238_v60 = vrot.slane %v1237_v49, 2 }
 0x374   : > { %v1239_v57 = vmax.f32 %v1237_v49, %v1238_v60 }
 0x376   : > { %v1240_v30 = vrot.slane %v1239_v57, 1 }
 0x377   : > { %v1187_v4 = vpop.f32.mrf.mxu3 }
 0x378   : > { %v1188_v33 = vadd.f32 %v1187_v4, %v2120_v43  ;;  %v1241_v13 = vmax.f32 %v1239_v57, %v1240_v30  ;;  %v1288_v4 = vld [vmem:[#allocation2] sm:$0x3] }
 0x37a   : > { %v1265_v36 = vmax.f32 %v1263_v28, %v1188_v33 }
 0x37f   : > { %v1190_v32 = vpop.f32.mrf.mxu3 }
 0x380   : > { %v1191_v27 = vadd.f32 %v1190_v32, %v2120_v43 }
 0x382   : > { %v1266_v40 = vmax.f32 %v1264_v35, %v1191_v27 }
 0x387   : > { %v1192_v48 = vpop.f32.mrf.mxu3 }
 0x388   : > { %v1193_v34 = vadd.f32 %v1192_v48, %v2120_v43 }
 0x38a   : > { %v1267_v41 = vmax.f32 %v1265_v36, %v1193_v34 }
 0x38f   : > { %v1195_v7 = vpop.f32.mrf.mxu3 }
 0x390   : > { %v1196_v17 = vadd.f32 %v1195_v7, %v2120_v43 }
 0x392   : > { %v1268_v20 = vmax.f32 %v1266_v40, %v1196_v17 }
 0x397   : > { %v1197_v12 = vpop.f32.mrf.mxu3 }
 0x398   : > { %v1198_v38 = vadd.f32 %v1197_v12, %v2120_v43 }
 0x39a   : > { %v1269_v42 = vmax.f32 %v1267_v41, %v1198_v38 }
 0x39f   : > { %v1200_v8 = vpop.f32.mrf.mxu3 }
 0x3a0   : > { %v1201_v44 = vadd.f32 %v1200_v8, %v2120_v43 }
 0x3a2   : > { %v1270_v50 = vmax.f32 %v1268_v20, %v1201_v44 }
 0x3a7   : > { %v1202_v45 = vpop.f32.mrf.mxu3 }
 0x3a8   : > { %v1203_v47 = vadd.f32 %v1202_v45, %v2120_v43 }
 0x3aa   : > { %v1271_v51 = vmax.f32 %v1269_v42, %v1203_v47 }
 0x3ac   : > { %v1272_v52 = vmax.f32 %v1270_v50, %v1271_v51 }
 0x3ae   : > { %v1273_v3 = vrot.slane %v1272_v52, 4 }
 0x3b0   : > { %v1274_v56 = vmax.f32 %v1272_v52, %v1273_v3 }
 0x3b2   : > { %v1275_v59 = vrot.slane %v1274_v56, 2 }
 0x3b4   : > { %v1276_v61 = vmax.f32 %v1274_v56, %v1275_v59 }
 0x3b6   : > { %v1277_v62 = vrot.slane %v1276_v61, 1 }
 0x3b8   : > { %v1278_v58 = vmax.f32 %v1276_v61, %v1277_v62 }
 0x3ba   : > { %v1291_v2 = vrot.slane %v1278_v58, 7 }
 0x3bc   : > { %v1293_v43 = vsel %vm1292_vm2, %v1241_v13, %v1291_v2 }
 0x3bd   : > { %v1295_v63 = vmax.f32 %v1288_v4, %v1293_v43 }
 0x3bf   : > { %1300 = vst.msk [vmem:[#allocation2] sm:$0x3] %vm2191_vm1, %v1295_v63 }
 0x3c6   : > { %v1304_v25 = vld [vmem:[#allocation2] sm:$0x3] }
 0x3c7   : > { %1305 = vst.msk [vmem:[%s327_s30] sm:$0x3] %vm2191_vm1, %v1304_v25 }
 0x3c8   : > { %1712 = shalt.err (!%p1709_p9)
}
 0x3c9   : > { %1569 = dma.vmem_to_hbm [thread:$0]  (%p1856_p4), %s1322_s8, 32, %s1324_s10, %s1307_s12  }
 0x3ca PF: > { %p1581_p10 = scmp.ge.s32.totalorder %s1767_s29, 2  ;;  %s1335_s18 = sand.u32 1, %s1747_s24  }
 0x3cb   : > { %s1336_s22 = scalar_lea.sflag [#allocation5], %s1335_s18 }
 0x3cc   : > { %p1576_p11 = pnand %p1581_p10, %p1863_p8 }
 0x3ce   : > { %p1577_p12 = pneg %p1576_p11 }
 0x3d0   : > { %1742 = dma.done.wait (%p1577_p12), %s1336_s22, 32  }
 0x3d1   : > { %1744 = vsyncadd (%p1577_p12), %s1336_s22, 4294967264  ;;  %s21_s29 = sadd.s32 1, %s1767_s29   ;;  %s2271_s24 = smov %s1751_s25 }
 0x3d2   : > { %p18_p13 = scmp.ge.s32.totalorder %s21_s29, 4   ;;  %s2272_s25 = smov %s1755_s26 }
 0x3d3   : > { %s2273_s26 = smov %s1869_s14  ;;  %s2274_s27 = smov %s1763_s28 }
 0x3d4   : > { %s2275_s28 = smov %s2277_s9  ;;  %20 = sbr.rel (!%p18_p13) target bundleno = 5 (0x5), region = 96 }
 0x3d9   :  { %1342 = vsyncpa [#allocation4], 1 }
 0x3da   :  { %1344 = vsyncpa [#allocation4 + $0x1], 1 }
 0x3db   :  { %1345 = vsyncpa [#allocation5], 1 }
 0x3dc   :  { %1347 = vsyncpa [#allocation5 + $0x1], 1 }

</bundles_post_ra>
